<compile_context>
chip_gen: v7x
topology: tpu7x:2x2x1
jax: 0.10.0
libtpu: 0.0.40
codegen_flags: <defaults>
</compile_context>

<pallas_src>
import functools

import jax
import jax.numpy as jnp
from jax.experimental import pallas as pl
from jax.experimental.pallas import tpu as pltpu


_VMEM_LIMIT = 32 * 1024 * 1024  # safe on v5e/v6e (128 MiB) and v7x (64 MiB)


def _tile(dim, pref, base):
    """Largest block size <= pref that is a multiple of `base` and divides
    `dim`; falls back to the full dim (always a legal block shape)."""
    if dim <= pref:
        return dim
    t = (pref // base) * base
    while t >= base:
        if dim % t == 0:
            return t
        t -= base
    return dim


# ----------------------------- Pallas kernels -----------------------------

def _linear_kernel(*refs, activation, has_bias, has_res):
    # Tiled matmul with f32 accumulator + fused bias / QuickGELU / residual.
    i = 0
    x_ref = refs[i]; i += 1           # (tm, tk)  bf16
    w_ref = refs[i]; i += 1           # (tk, tn)  bf16
    b_ref = None
    res_ref = None
    if has_bias:
        b_ref = refs[i]; i += 1       # (1, tn)   f32
    if has_res:
        res_ref = refs[i]; i += 1     # (tm, tn)
    o_ref = refs[i]                   # (tm, tn)
    acc_ref = refs[i + 1]             # (tm, tn)  f32 scratch

    k = pl.program_id(2)

    @pl.when(k == 0)
    def _init():
        acc_ref[...] = jnp.zeros_like(acc_ref)

    acc_ref[...] += jnp.dot(x_ref[...], w_ref[...],
                            preferred_element_type=jnp.float32)

    @pl.when(k == pl.num_programs(2) - 1)
    def _finalize():
        out = acc_ref[...]
        if has_bias:
            out = out + b_ref[...]
        if activation == "quick_gelu":
            out = out * jax.nn.sigmoid(1.702 * out)
        if has_res:
            out = out + res_ref[...].astype(jnp.float32)
        o_ref[...] = out.astype(o_ref.dtype)


def _layernorm_kernel(x_ref, g_ref, b_ref, o_ref, *, eps):
    # LayerNorm over the last (feature) dim in f32; tiled over rows.
    x = x_ref[...].astype(jnp.float32)
    mu = jnp.mean(x, axis=-1, keepdims=True)
    var = jnp.mean(jnp.square(x - mu), axis=-1, keepdims=True)
    y = (x - mu) * jax.lax.rsqrt(var + eps) * g_ref[...] + b_ref[...]
    o_ref[...] = y.astype(o_ref.dtype)


def _attention_kernel(q_ref, k_ref, v_ref, o_ref, *, heads, dh, scale):
    # One batch element per grid step; q/k/v/o blocks: (1, L, width).
    # Heads are processed as lane-dim slices -> no transposes in or out.
    # TODO(synk): for very large (H, L) (e.g. ViT-L on v7x) split the grid over
    # (B, head-groups) so the (L, L) score tensors pipeline through VMEM.
    for h in range(heads):
        sl = pl.ds(h * dh, dh)
        q = q_ref[0, :, sl]                      # (L, dh) bf16
        k = k_ref[0, :, sl]
        v = v_ref[0, :, sl]
        s = jax.lax.dot_general(q, k, (((1,), (1,)), ((), ())),
                                preferred_element_type=jnp.float32)
        s = s * scale
        m = jnp.max(s, axis=-1, keepdims=True)
        p = jnp.exp(s - m)
        l = jnp.sum(p, axis=-1, keepdims=True)
        o = jnp.dot(p.astype(v.dtype), v, preferred_element_type=jnp.float32)
        # Normalise AFTER P@V (L*dh elements) with EUP approx reciprocal.
        o = o * pl.reciprocal(l, approx=True)
        o_ref[0, :, sl] = o.astype(o_ref.dtype)


# ----------------------------- kernel wrappers -----------------------------

def linear_pallas(x, w, b=None, residual=None, activation=None,
                  out_dtype=jnp.bfloat16,
                  tm_pref=256, tn_pref=512, tk_pref=512):
    """out = act(x @ w + b) + residual, tiled + pipelined, bf16 MXU, f32 acc."""
    M, K = x.shape
    Kw, N = w.shape
    assert K == Kw
    tm = _tile(M, tm_pref, 8)
    tn = _tile(N, tn_pref, 128)
    tk = _tile(K, tk_pref, 128)
    grid = (M // tm, N // tn, K // tk)

    args = [x.astype(jnp.bfloat16), w.astype(jnp.bfloat16)]
    in_specs = [
        pl.BlockSpec((tm, tk), lambda i, j, k: (i, k)),
        pl.BlockSpec((tk, tn), lambda i, j, k: (k, j)),
    ]
    if b is not None:
        args.append(b.reshape(1, N).astype(jnp.float32))
        in_specs.append(pl.BlockSpec((1, tn), lambda i, j, k: (0, j)))
    if residual is not None:
        args.append(residual)
        in_specs.append(pl.BlockSpec((tm, tn), lambda i, j, k: (i, j)))

    kern = functools.partial(_linear_kernel, activation=activation,
                             has_bias=b is not None,
                             has_res=residual is not None)

    return pl.pallas_call(
        kern,
        out_shape=jax.ShapeDtypeStruct((M, N), out_dtype),
        grid=grid,
        in_specs=in_specs,
        out_specs=pl.BlockSpec((tm, tn), lambda i, j, k: (i, j)),
        scratch_shapes=[pltpu.VMEM((tm, tn), jnp.float32)],
        compiler_params=pltpu.CompilerParams(
            dimension_semantics=("parallel", "parallel", "arbitrary"),
            vmem_limit_bytes=_VMEM_LIMIT),
    )(*args)


def layernorm_pallas(x, gamma, beta, eps=1e-5, out_dtype=jnp.bfloat16,
                     tm_pref=512):
    M, D = x.shape
    tm = _tile(M, tm_pref, 8)
    return pl.pallas_call(
        functools.partial(_layernorm_kernel, eps=eps),
        out_shape=jax.ShapeDtypeStruct((M, D), out_dtype),
        grid=(M // tm,),
        in_specs=[
            pl.BlockSpec((tm, D), lambda i: (i, 0)),
            pl.BlockSpec((1, D), lambda i: (0, 0)),
            pl.BlockSpec((1, D), lambda i: (0, 0)),
        ],
        out_specs=pl.BlockSpec((tm, D), lambda i: (i, 0)),
        compiler_params=pltpu.CompilerParams(
            dimension_semantics=("parallel",),
            vmem_limit_bytes=_VMEM_LIMIT),
    )(x, gamma.reshape(1, D).astype(jnp.float32),
      beta.reshape(1, D).astype(jnp.float32))


def attention_pallas(q, k, v, scale, heads):
    # q, k, v: (B, L, width) bf16 (token-major, lane-dense); output same layout
    # so the out-projection consumes it with no transpose in between.
    B, L, width = q.shape
    dh = width // heads
    spec = pl.BlockSpec((1, L, width), lambda b: (b, 0, 0))
    return pl.pallas_call(
        functools.partial(_attention_kernel, heads=heads, dh=dh, scale=scale),
        out_shape=jax.ShapeDtypeStruct((B, L, width), jnp.bfloat16),
        grid=(B,),
        in_specs=[spec, spec, spec],
        out_specs=spec,
        compiler_params=pltpu.CompilerParams(
            dimension_semantics=("parallel",),
            vmem_limit_bytes=_VMEM_LIMIT),
    )(q.astype(jnp.bfloat16), k.astype(jnp.bfloat16), v.astype(jnp.bfloat16))


# ----------------------------- model parameters -----------------------------

def init_params(key, *, in_ch, patch, width, heads, layers, num_patches,
                proj_dim, num_classes, extra_fc):
    del heads  # head count only affects reshapes, not parameter shapes
    keys = iter(jax.random.split(key, 16 + 16 * layers))

    def nrm(shape, s=0.02, dtype=jnp.float32):
        return (s * jax.random.normal(next(keys), shape)).astype(dtype)

    def nrm_bf16(shape, s=0.02):
        return nrm(shape, s, jnp.bfloat16)   # matmul weights live in bf16

    L = num_patches + 1
    params = {
        # conv1 weight (width, C, P, P) flattened to (C*P*P, width) matmul form
        "conv_w": nrm_bf16((in_ch * patch * patch, width)),
        "class_embedding": nrm((width,)),
        "positional_embedding": nrm((L, width)),
        "ln_pre_g": jnp.ones((width,), jnp.float32),
        "ln_pre_b": jnp.zeros((width,), jnp.float32),
        "ln_post_g": jnp.ones((width,), jnp.float32),
        "ln_post_b": jnp.zeros((width,), jnp.float32),
        "blocks": [],
    }
    for _ in range(layers):
        in_proj_w = nrm_bf16((width, 3 * width))     # stored transposed (x @ W)
        in_proj_b = nrm((3 * width,))
        blk = {
            "ln1_g": jnp.ones((width,), jnp.float32),
            "ln1_b": jnp.zeros((width,), jnp.float32),
            # split QKV so attention never needs an XLA transpose of the output
            "wq": in_proj_w[:, 0 * width:1 * width],
            "wk": in_proj_w[:, 1 * width:2 * width],
            "wv": in_proj_w[:, 2 * width:3 * width],
            "bq": in_proj_b[0 * width:1 * width],
            "bk": in_proj_b[1 * width:2 * width],
            "bv": in_proj_b[2 * width:3 * width],
            "out_proj_w": nrm_bf16((width, width)),
            "out_proj_b": nrm((width,)),
            "ln2_g": jnp.ones((width,), jnp.float32),
            "ln2_b": jnp.zeros((width,), jnp.float32),
            "fc1_w": nrm_bf16((width, 4 * width)),
            "fc1_b": nrm((4 * width,)),
            "fc2_w": nrm_bf16((4 * width, width)),
            "fc2_b": nrm((width,)),
        }
        params["blocks"].append(blk)

    head_in = proj_dim if extra_fc else width
    if extra_fc:
        params["proj_w"] = nrm_bf16((width, proj_dim))   # Project: no bias
    params["fc_w"] = nrm_bf16((head_in, num_classes))
    params["fc_b"] = jnp.zeros((num_classes,), jnp.float32)
    return params


# ----------------------------- forward pass -----------------------------

def vit_clip_forward(params, x, *, patch, heads, extra_fc):
    B, C, H, W = x.shape
    P = patch
    Hg, Wg = H // P, W // P
    Np = Hg * Wg
    width = params["conv_w"].shape[1]

    # conv1 (stride = kernel = P, no bias) == patchify (XLA glue) + matmul
    xp = (
        x.reshape(B, C, Hg, P, Wg, P)
        .transpose(0, 2, 4, 1, 3, 5)          # (B, Hg, Wg, C, P, P)
        .reshape(B * Np, C * P * P)
    )
    tokens = linear_pallas(xp, params["conv_w"], out_dtype=jnp.float32)
    tokens = tokens.reshape(B, Np, width)

    # EmbedCLIP: prepend class token, add positional embedding (XLA glue)
    cls = jnp.broadcast_to(params["class_embedding"][None, None, :], (B, 1, width))
    h = jnp.concatenate([cls, tokens], axis=1) + params["positional_embedding"][None]
    L = h.shape[1]
    h = h.reshape(B * L, width)

    # ln_pre -> residual stream (kept in f32)
    h = layernorm_pallas(h, params["ln_pre_g"], params["ln_pre_b"],
                         out_dtype=jnp.float32)

    Dh = width // heads
    scale = Dh ** -0.5

    # transformer: residual attention blocks
    for blk in params["blocks"]:
        y = layernorm_pallas(h, blk["ln1_g"], blk["ln1_b"])       # bf16
        q = linear_pallas(y, blk["wq"], blk["bq"]).reshape(B, L, width)
        k = linear_pallas(y, blk["wk"], blk["bk"]).reshape(B, L, width)
        v = linear_pallas(y, blk["wv"], blk["bv"]).reshape(B, L, width)
        attn = attention_pallas(q, k, v, scale, heads).reshape(B * L, width)
        # out-proj with the residual add fused into the matmul epilogue
        h = linear_pallas(attn, blk["out_proj_w"], blk["out_proj_b"],
                          residual=h, out_dtype=jnp.float32)

        y = layernorm_pallas(h, blk["ln2_g"], blk["ln2_b"])       # bf16
        y = linear_pallas(y, blk["fc1_w"], blk["fc1_b"], activation="quick_gelu")
        h = linear_pallas(y, blk["fc2_w"], blk["fc2_b"],
                          residual=h, out_dtype=jnp.float32)

    # ln_post on the class token only: x[:, 0, :]
    h = h.reshape(B, L, width)
    cls_out = layernorm_pallas(h[:, 0, :], params["ln_post_g"], params["ln_post_b"])

    if extra_fc:
        cls_out = linear_pallas(cls_out, params["proj_w"])        # bias-free Project

    logits = linear_pallas(cls_out, params["fc_w"], params["fc_b"],
                           out_dtype=jnp.float32)
    return logits


# ----------------------------- main -----------------------------

if __name__ == "__main__":
    # Small, forward-consistent shapes (scaled-down CLIP ViT):
    B, C, IMG, PATCH = 2, 3, 16, 8        # -> 2x2 = 4 patches, seq len 5
    WIDTH, HEADS, LAYERS = 32, 4, 2
    PROJ_DIM, NUM_CLASSES = 16, 10        # (768/512 in the real module; scaled)
    EXTRA_FC = True

    key = jax.random.PRNGKey(0)
    k_params, k_x = jax.random.split(key)

    params = init_params(
        k_params, in_ch=C, patch=PATCH, width=WIDTH, heads=HEADS, layers=LAYERS,
        num_patches=(IMG // PATCH) ** 2, proj_dim=PROJ_DIM,
        num_classes=NUM_CLASSES, extra_fc=EXTRA_FC,
    )
    x = jax.random.normal(k_x, (B, C, IMG, IMG), dtype=jnp.float32)

    fwd = jax.jit(functools.partial(vit_clip_forward, patch=PATCH, heads=HEADS,
                                    extra_fc=EXTRA_FC))
    logits = fwd(params, x)
    logits = jax.block_until_ready(logits)

    assert logits.shape == (B, NUM_CLASSES), logits.shape
    assert bool(jnp.all(jnp.isfinite(logits)))
    print("KERNEL_OK")
</pallas_src>

<mosaic_0001>
module attributes {stable_mosaic.version = 11 : i64} {
  func.func @_linear_kernel(%arg0: i32, %arg1: i32, %arg2: i32, %arg3: memref<8x192xbf16, #tpu.memory_space<vmem>>, %arg4: memref<192x32xbf16, #tpu.memory_space<vmem>>, %arg5: memref<8x32xf32, #tpu.memory_space<vmem>>, %arg6: memref<8x32xf32, #tpu.memory_space<vmem>>) attributes {dimension_semantics = [#tpu.dimension_semantics<parallel>, #tpu.dimension_semantics<parallel>, #tpu.dimension_semantics<arbitrary>], iteration_bounds = array<i64: 1, 1, 1>, scalar_prefetch = 0 : i64, scratch_operands = 1 : i64, tpu.core_type = #tpu.core_type<tc>, window_params = [{transform_indices = @transform_0, window_bounds = array<i64: 8, 192>}, {transform_indices = @transform_1, window_bounds = array<i64: 192, 32>}, {transform_indices = @transform_2, window_bounds = array<i64: 8, 32>}]} {
    %c0_i32 = arith.constant 0 : i32
    %0 = arith.cmpi eq, %arg2, %c0_i32 : i32
    %1 = arith.extui %0 : i1 to i32
    %c0_i32_0 = arith.constant 0 : i32
    %2 = arith.cmpi ne, %1, %c0_i32_0 : i32
    scf.if %2 {
      %cst_10 = arith.constant 0.000000e+00 : f32
      %12 = vector.broadcast %cst_10 : f32 to vector<8x32xf32>
      %c0_11 = arith.constant 0 : index
      %c0_12 = arith.constant 0 : index
      %13 = vector.load %arg6[%c0_11, %c0_12] : memref<8x32xf32, #tpu.memory_space<vmem>>, vector<8x32xf32>
      tpu.vector_store %arg6[%c0_11, %c0_12], %12 {strides = array<i32>} : memref<8x32xf32, #tpu.memory_space<vmem>>, vector<8x32xf32>,
    } else {
    }
    %c0 = arith.constant 0 : index
    %c0_1 = arith.constant 0 : index
    %3 = vector.load %arg6[%c0, %c0_1] : memref<8x32xf32, #tpu.memory_space<vmem>>, vector<8x32xf32>
    %c0_2 = arith.constant 0 : index
    %c0_3 = arith.constant 0 : index
    %4 = vector.load %arg3[%c0_2, %c0_3] : memref<8x192xbf16, #tpu.memory_space<vmem>>, vector<8x192xbf16>
    %c0_4 = arith.constant 0 : index
    %c0_5 = arith.constant 0 : index
    %5 = vector.load %arg4[%c0_4, %c0_5] : memref<192x32xbf16, #tpu.memory_space<vmem>>, vector<192x32xbf16>
    %cst = arith.constant dense<0.000000e+00> : vector<8x32xf32>
    %6 = tpu.matmul %4, %5, %cst {dimension_numbers = #tpu.dot_dimension_numbers<[1], [0], [0], [1], [0, 0, 1, 1], [], []>} : vector<8x192xbf16>, vector<192x32xbf16>, vector<8x32xf32> -> vector<8x32xf32>
    %7 = arith.addf %3, %6 : vector<8x32xf32>
    %c0_6 = arith.constant 0 : index
    %c0_7 = arith.constant 0 : index
    %8 = vector.load %arg6[%c0_6, %c0_7] : memref<8x32xf32, #tpu.memory_space<vmem>>, vector<8x32xf32>
    tpu.vector_store %arg6[%c0_6, %c0_7], %7 {strides = array<i32>} : memref<8x32xf32, #tpu.memory_space<vmem>>, vector<8x32xf32>,
    %c0_i32_8 = arith.constant 0 : i32
    %9 = arith.cmpi eq, %arg2, %c0_i32_8 : i32
    %10 = arith.extui %9 : i1 to i32
    %c0_i32_9 = arith.constant 0 : i32
    %11 = arith.cmpi ne, %10, %c0_i32_9 : i32
    scf.if %11 {
      %c0_10 = arith.constant 0 : index
      %c0_11 = arith.constant 0 : index
      %12 = vector.load %arg6[%c0_10, %c0_11] : memref<8x32xf32, #tpu.memory_space<vmem>>, vector<8x32xf32>
      %c0_12 = arith.constant 0 : index
      %c0_13 = arith.constant 0 : index
      %13 = vector.load %arg5[%c0_12, %c0_13] : memref<8x32xf32, #tpu.memory_space<vmem>>, vector<8x32xf32>
      tpu.vector_store %arg5[%c0_12, %c0_13], %12 {strides = array<i32>} : memref<8x32xf32, #tpu.memory_space<vmem>>, vector<8x32xf32>,
    } else {
    }
    return
  }
  func.func @transform_0(%arg0: i32, %arg1: i32, %arg2: i32) -> (i32, i32) {
    %c0_i32 = arith.constant 0 : i32
    return %arg0, %arg2 : i32, i32
  }
  func.func @transform_1(%arg0: i32, %arg1: i32, %arg2: i32) -> (i32, i32) {
    %c0_i32 = arith.constant 0 : i32
    return %arg2, %arg1 : i32, i32
  }
  func.func @transform_2(%arg0: i32, %arg1: i32, %arg2: i32) -> (i32, i32) {
    %c0_i32 = arith.constant 0 : i32
    return %arg0, %arg1 : i32, i32
  }
}

module attributes {stable_mosaic.version = 11 : i64} {
  func.func @_layernorm_kernel(%arg0: i32, %arg1: memref<10x32xf32, #tpu.memory_space<vmem>>, %arg2: memref<1x32xf32, #tpu.memory_space<vmem>>, %arg3: memref<1x32xf32, #tpu.memory_space<vmem>>, %arg4: memref<10x32xf32, #tpu.memory_space<vmem>>) attributes {dimension_semantics = [#tpu.dimension_semantics<parallel>], iteration_bounds = array<i64: 1>, scalar_prefetch = 0 : i64, scratch_operands = 0 : i64, tpu.core_type = #tpu.core_type<tc>, window_params = [{transform_indices = @transform_0, window_bounds = array<i64: 10, 32>}, {pipeline_mode = #tpu.pipeline_mode<synchronous>, transform_indices = @transform_1, window_bounds = array<i64: 1, 32>}, {pipeline_mode = #tpu.pipeline_mode<synchronous>, transform_indices = @transform_2, window_bounds = array<i64: 1, 32>}, {transform_indices = @transform_3, window_bounds = array<i64: 10, 32>}]} {
    %c0 = arith.constant 0 : index
    %c0_0 = arith.constant 0 : index
    %0 = vector.load %arg1[%c0, %c0_0] : memref<10x32xf32, #tpu.memory_space<vmem>>, vector<10x32xf32>
    %cst = arith.constant dense<0.000000e+00> : vector<10xf32>
    %1 = vector.multi_reduction <add>, %0, %cst [1] : vector<10x32xf32> to vector<10xf32>
    %2 = vector.shape_cast %1 : vector<10xf32> to vector<10x1xf32>
    %cst_1 = arith.constant 3.200000e+01 : f32
    %3 = vector.broadcast %cst_1 : f32 to vector<10x1xf32>
    %4 = arith.divf %2, %3 : vector<10x1xf32>
    %5 = vector.broadcast %4 : vector<10x1xf32> to vector<10x32xf32>
    %6 = arith.subf %0, %5 : vector<10x32xf32>
    %7 = arith.mulf %6, %6 : vector<10x32xf32>
    %cst_2 = arith.constant dense<0.000000e+00> : vector<10xf32>
    %8 = vector.multi_reduction <add>, %7, %cst_2 [1] : vector<10x32xf32> to vector<10xf32>
    %9 = vector.shape_cast %8 : vector<10xf32> to vector<10x1xf32>
    %cst_3 = arith.constant 3.200000e+01 : f32
    %10 = vector.broadcast %cst_3 : f32 to vector<10x1xf32>
    %11 = arith.divf %9, %10 : vector<10x1xf32>
    %12 = vector.broadcast %4 : vector<10x1xf32> to vector<10x32xf32>
    %13 = arith.subf %0, %12 : vector<10x32xf32>
    %cst_4 = arith.constant 9.99999974E-6 : f32
    %14 = vector.broadcast %cst_4 : f32 to vector<10x1xf32>
    %15 = arith.addf %11, %14 : vector<10x1xf32>
    %16 = math.rsqrt %15 : vector<10x1xf32>
    %17 = vector.broadcast %16 : vector<10x1xf32> to vector<10x32xf32>
    %18 = arith.mulf %13, %17 : vector<10x32xf32>
    %c0_5 = arith.constant 0 : index
    %c0_6 = arith.constant 0 : index
    %19 = vector.load %arg2[%c0_5, %c0_6] : memref<1x32xf32, #tpu.memory_space<vmem>>, vector<1x32xf32>
    %20 = vector.broadcast %19 : vector<1x32xf32> to vector<10x32xf32>
    %21 = arith.mulf %18, %20 : vector<10x32xf32>
    %c0_7 = arith.constant 0 : index
    %c0_8 = arith.constant 0 : index
    %22 = vector.load %arg3[%c0_7, %c0_8] : memref<1x32xf32, #tpu.memory_space<vmem>>, vector<1x32xf32>
    %23 = vector.broadcast %22 : vector<1x32xf32> to vector<10x32xf32>
    %24 = arith.addf %21, %23 : vector<10x32xf32>
    %c0_9 = arith.constant 0 : index
    %c0_10 = arith.constant 0 : index
    %25 = vector.load %arg4[%c0_9, %c0_10] : memref<10x32xf32, #tpu.memory_space<vmem>>, vector<10x32xf32>
    tpu.vector_store %arg4[%c0_9, %c0_10], %24 {strides = array<i32>} : memref<10x32xf32, #tpu.memory_space<vmem>>, vector<10x32xf32>,
    return
  }
  func.func @transform_0(%arg0: i32) -> (i32, i32) {
    %c0_i32 = arith.constant 0 : i32
    %c0_i32_0 = arith.constant 0 : i32
    return %arg0, %c0_i32 : i32, i32
  }
  func.func @transform_1(%arg0: i32) -> (i32, i32) {
    %c0_i32 = arith.constant 0 : i32
    %c0_i32_0 = arith.constant 0 : i32
    %c0_i32_1 = arith.constant 0 : i32
    return %c0_i32, %c0_i32_0 : i32, i32
  }
  func.func @transform_2(%arg0: i32) -> (i32, i32) {
    %c0_i32 = arith.constant 0 : i32
    %c0_i32_0 = arith.constant 0 : i32
    %c0_i32_1 = arith.constant 0 : i32
    return %c0_i32, %c0_i32_0 : i32, i32
  }
  func.func @transform_3(%arg0: i32) -> (i32, i32) {
    %c0_i32 = arith.constant 0 : i32
    %c0_i32_0 = arith.constant 0 : i32
    return %arg0, %c0_i32 : i32, i32
  }
}

module attributes {stable_mosaic.version = 11 : i64} {
  func.func @_layernorm_kernel(%arg0: i32, %arg1: memref<10x32xf32, #tpu.memory_space<vmem>>, %arg2: memref<1x32xf32, #tpu.memory_space<vmem>>, %arg3: memref<1x32xf32, #tpu.memory_space<vmem>>, %arg4: memref<10x32xbf16, #tpu.memory_space<vmem>>) attributes {dimension_semantics = [#tpu.dimension_semantics<parallel>], iteration_bounds = array<i64: 1>, scalar_prefetch = 0 : i64, scratch_operands = 0 : i64, tpu.core_type = #tpu.core_type<tc>, window_params = [{transform_indices = @transform_0, window_bounds = array<i64: 10, 32>}, {pipeline_mode = #tpu.pipeline_mode<synchronous>, transform_indices = @transform_1, window_bounds = array<i64: 1, 32>}, {pipeline_mode = #tpu.pipeline_mode<synchronous>, transform_indices = @transform_2, window_bounds = array<i64: 1, 32>}, {transform_indices = @transform_3, window_bounds = array<i64: 10, 32>}]} {
    %c0 = arith.constant 0 : index
    %c0_0 = arith.constant 0 : index
    %0 = vector.load %arg1[%c0, %c0_0] : memref<10x32xf32, #tpu.memory_space<vmem>>, vector<10x32xf32>
    %cst = arith.constant dense<0.000000e+00> : vector<10xf32>
    %1 = vector.multi_reduction <add>, %0, %cst [1] : vector<10x32xf32> to vector<10xf32>
    %2 = vector.shape_cast %1 : vector<10xf32> to vector<10x1xf32>
    %cst_1 = arith.constant 3.200000e+01 : f32
    %3 = vector.broadcast %cst_1 : f32 to vector<10x1xf32>
    %4 = arith.divf %2, %3 : vector<10x1xf32>
    %5 = vector.broadcast %4 : vector<10x1xf32> to vector<10x32xf32>
    %6 = arith.subf %0, %5 : vector<10x32xf32>
    %7 = arith.mulf %6, %6 : vector<10x32xf32>
    %cst_2 = arith.constant dense<0.000000e+00> : vector<10xf32>
    %8 = vector.multi_reduction <add>, %7, %cst_2 [1] : vector<10x32xf32> to vector<10xf32>
    %9 = vector.shape_cast %8 : vector<10xf32> to vector<10x1xf32>
    %cst_3 = arith.constant 3.200000e+01 : f32
    %10 = vector.broadcast %cst_3 : f32 to vector<10x1xf32>
    %11 = arith.divf %9, %10 : vector<10x1xf32>
    %12 = vector.broadcast %4 : vector<10x1xf32> to vector<10x32xf32>
    %13 = arith.subf %0, %12 : vector<10x32xf32>
    %cst_4 = arith.constant 9.99999974E-6 : f32
    %14 = vector.broadcast %cst_4 : f32 to vector<10x1xf32>
    %15 = arith.addf %11, %14 : vector<10x1xf32>
    %16 = math.rsqrt %15 : vector<10x1xf32>
    %17 = vector.broadcast %16 : vector<10x1xf32> to vector<10x32xf32>
    %18 = arith.mulf %13, %17 : vector<10x32xf32>
    %c0_5 = arith.constant 0 : index
    %c0_6 = arith.constant 0 : index
    %19 = vector.load %arg2[%c0_5, %c0_6] : memref<1x32xf32, #tpu.memory_space<vmem>>, vector<1x32xf32>
    %20 = vector.broadcast %19 : vector<1x32xf32> to vector<10x32xf32>
    %21 = arith.mulf %18, %20 : vector<10x32xf32>
    %c0_7 = arith.constant 0 : index
    %c0_8 = arith.constant 0 : index
    %22 = vector.load %arg3[%c0_7, %c0_8] : memref<1x32xf32, #tpu.memory_space<vmem>>, vector<1x32xf32>
    %23 = vector.broadcast %22 : vector<1x32xf32> to vector<10x32xf32>
    %24 = arith.addf %21, %23 : vector<10x32xf32>
    %25 = arith.truncf %24 : vector<10x32xf32> to vector<10x32xbf16>
    %c0_9 = arith.constant 0 : index
    %c0_10 = arith.constant 0 : index
    %26 = vector.load %arg4[%c0_9, %c0_10] : memref<10x32xbf16, #tpu.memory_space<vmem>>, vector<10x32xbf16>
    tpu.vector_store %arg4[%c0_9, %c0_10], %25 {strides = array<i32>} : memref<10x32xbf16, #tpu.memory_space<vmem>>, vector<10x32xbf16>,
    return
  }
  func.func @transform_0(%arg0: i32) -> (i32, i32) {
    %c0_i32 = arith.constant 0 : i32
    %c0_i32_0 = arith.constant 0 : i32
    return %arg0, %c0_i32 : i32, i32
  }
  func.func @transform_1(%arg0: i32) -> (i32, i32) {
    %c0_i32 = arith.constant 0 : i32
    %c0_i32_0 = arith.constant 0 : i32
    %c0_i32_1 = arith.constant 0 : i32
    return %c0_i32, %c0_i32_0 : i32, i32
  }
  func.func @transform_2(%arg0: i32) -> (i32, i32) {
    %c0_i32 = arith.constant 0 : i32
    %c0_i32_0 = arith.constant 0 : i32
    %c0_i32_1 = arith.constant 0 : i32
    return %c0_i32, %c0_i32_0 : i32, i32
  }
  func.func @transform_3(%arg0: i32) -> (i32, i32) {
    %c0_i32 = arith.constant 0 : i32
    %c0_i32_0 = arith.constant 0 : i32
    return %arg0, %c0_i32 : i32, i32
  }
}

module attributes {stable_mosaic.version = 11 : i64} {
  func.func @_linear_kernel(%arg0: i32, %arg1: i32, %arg2: i32, %arg3: memref<10x32xbf16, #tpu.memory_space<vmem>>, %arg4: memref<32x32xbf16, #tpu.memory_space<vmem>>, %arg5: memref<1x32xf32, #tpu.memory_space<vmem>>, %arg6: memref<10x32xbf16, #tpu.memory_space<vmem>>, %arg7: memref<10x32xf32, #tpu.memory_space<vmem>>) attributes {dimension_semantics = [#tpu.dimension_semantics<parallel>, #tpu.dimension_semantics<parallel>, #tpu.dimension_semantics<arbitrary>], iteration_bounds = array<i64: 1, 1, 1>, scalar_prefetch = 0 : i64, scratch_operands = 1 : i64, tpu.core_type = #tpu.core_type<tc>, window_params = [{transform_indices = @transform_0, window_bounds = array<i64: 10, 32>}, {transform_indices = @transform_1, window_bounds = array<i64: 32, 32>}, {transform_indices = @transform_2, window_bounds = array<i64: 1, 32>}, {transform_indices = @transform_3, window_bounds = array<i64: 10, 32>}]} {
    %c0_i32 = arith.constant 0 : i32
    %0 = arith.cmpi eq, %arg2, %c0_i32 : i32
    %1 = arith.extui %0 : i1 to i32
    %c0_i32_0 = arith.constant 0 : i32
    %2 = arith.cmpi ne, %1, %c0_i32_0 : i32
    scf.if %2 {
      %cst_10 = arith.constant 0.000000e+00 : f32
      %12 = vector.broadcast %cst_10 : f32 to vector<10x32xf32>
      %c0_11 = arith.constant 0 : index
      %c0_12 = arith.constant 0 : index
      %13 = vector.load %arg7[%c0_11, %c0_12] : memref<10x32xf32, #tpu.memory_space<vmem>>, vector<10x32xf32>
      tpu.vector_store %arg7[%c0_11, %c0_12], %12 {strides = array<i32>} : memref<10x32xf32, #tpu.memory_space<vmem>>, vector<10x32xf32>,
    } else {
    }
    %c0 = arith.constant 0 : index
    %c0_1 = arith.constant 0 : index
    %3 = vector.load %arg7[%c0, %c0_1] : memref<10x32xf32, #tpu.memory_space<vmem>>, vector<10x32xf32>
    %c0_2 = arith.constant 0 : index
    %c0_3 = arith.constant 0 : index
    %4 = vector.load %arg3[%c0_2, %c0_3] : memref<10x32xbf16, #tpu.memory_space<vmem>>, vector<10x32xbf16>
    %c0_4 = arith.constant 0 : index
    %c0_5 = arith.constant 0 : index
    %5 = vector.load %arg4[%c0_4, %c0_5] : memref<32x32xbf16, #tpu.memory_space<vmem>>, vector<32x32xbf16>
    %cst = arith.constant dense<0.000000e+00> : vector<10x32xf32>
    %6 = tpu.matmul %4, %5, %cst {dimension_numbers = #tpu.dot_dimension_numbers<[1], [0], [0], [1], [0, 0, 1, 1], [], []>} : vector<10x32xbf16>, vector<32x32xbf16>, vector<10x32xf32> -> vector<10x32xf32>
    %7 = arith.addf %3, %6 : vector<10x32xf32>
    %c0_6 = arith.constant 0 : index
    %c0_7 = arith.constant 0 : index
    %8 = vector.load %arg7[%c0_6, %c0_7] : memref<10x32xf32, #tpu.memory_space<vmem>>, vector<10x32xf32>
    tpu.vector_store %arg7[%c0_6, %c0_7], %7 {strides = array<i32>} : memref<10x32xf32, #tpu.memory_space<vmem>>, vector<10x32xf32>,
    %c0_i32_8 = arith.constant 0 : i32
    %9 = arith.cmpi eq, %arg2, %c0_i32_8 : i32
    %10 = arith.extui %9 : i1 to i32
    %c0_i32_9 = arith.constant 0 : i32
    %11 = arith.cmpi ne, %10, %c0_i32_9 : i32
    scf.if %11 {
      %c0_10 = arith.constant 0 : index
      %c0_11 = arith.constant 0 : index
      %12 = vector.load %arg7[%c0_10, %c0_11] : memref<10x32xf32, #tpu.memory_space<vmem>>, vector<10x32xf32>
      %c0_12 = arith.constant 0 : index
      %c0_13 = arith.constant 0 : index
      %13 = vector.load %arg5[%c0_12, %c0_13] : memref<1x32xf32, #tpu.memory_space<vmem>>, vector<1x32xf32>
      %14 = vector.broadcast %13 : vector<1x32xf32> to vector<10x32xf32>
      %15 = arith.addf %12, %14 : vector<10x32xf32>
      %16 = arith.truncf %15 : vector<10x32xf32> to vector<10x32xbf16>
      %c0_14 = arith.constant 0 : index
      %c0_15 = arith.constant 0 : index
      %17 = vector.load %arg6[%c0_14, %c0_15] : memref<10x32xbf16, #tpu.memory_space<vmem>>, vector<10x32xbf16>
      tpu.vector_store %arg6[%c0_14, %c0_15], %16 {strides = array<i32>} : memref<10x32xbf16, #tpu.memory_space<vmem>>, vector<10x32xbf16>,
    } else {
    }
    return
  }
  func.func @transform_0(%arg0: i32, %arg1: i32, %arg2: i32) -> (i32, i32) {
    %c0_i32 = arith.constant 0 : i32
    return %arg0, %arg2 : i32, i32
  }
  func.func @transform_1(%arg0: i32, %arg1: i32, %arg2: i32) -> (i32, i32) {
    %c0_i32 = arith.constant 0 : i32
    return %arg2, %arg1 : i32, i32
  }
  func.func @transform_2(%arg0: i32, %arg1: i32, %arg2: i32) -> (i32, i32) {
    %c0_i32 = arith.constant 0 : i32
    %c0_i32_0 = arith.constant 0 : i32
    return %c0_i32, %arg1 : i32, i32
  }
  func.func @transform_3(%arg0: i32, %arg1: i32, %arg2: i32) -> (i32, i32) {
    %c0_i32 = arith.constant 0 : i32
    return %arg0, %arg1 : i32, i32
  }
}

module attributes {stable_mosaic.version = 11 : i64} {
  func.func @_linear_kernel(%arg0: i32, %arg1: i32, %arg2: i32, %arg3: memref<10x32xbf16, #tpu.memory_space<vmem>>, %arg4: memref<32x128xbf16, #tpu.memory_space<vmem>>, %arg5: memref<1x128xf32, #tpu.memory_space<vmem>>, %arg6: memref<10x128xbf16, #tpu.memory_space<vmem>>, %arg7: memref<10x128xf32, #tpu.memory_space<vmem>>) attributes {dimension_semantics = [#tpu.dimension_semantics<parallel>, #tpu.dimension_semantics<parallel>, #tpu.dimension_semantics<arbitrary>], iteration_bounds = array<i64: 1, 1, 1>, scalar_prefetch = 0 : i64, scratch_operands = 1 : i64, tpu.core_type = #tpu.core_type<tc>, window_params = [{transform_indices = @transform_0, window_bounds = array<i64: 10, 32>}, {transform_indices = @transform_1, window_bounds = array<i64: 32, 128>}, {transform_indices = @transform_2, window_bounds = array<i64: 1, 128>}, {transform_indices = @transform_3, window_bounds = array<i64: 10, 128>}]} {
    %c0_i32 = arith.constant 0 : i32
    %0 = arith.cmpi eq, %arg2, %c0_i32 : i32
    %1 = arith.extui %0 : i1 to i32
    %c0_i32_0 = arith.constant 0 : i32
    %2 = arith.cmpi ne, %1, %c0_i32_0 : i32
    scf.if %2 {
      %cst_10 = arith.constant 0.000000e+00 : f32
      %12 = vector.broadcast %cst_10 : f32 to vector<10x128xf32>
      %c0_11 = arith.constant 0 : index
      %c0_12 = arith.constant 0 : index
      %13 = vector.load %arg7[%c0_11, %c0_12] : memref<10x128xf32, #tpu.memory_space<vmem>>, vector<10x128xf32>
      tpu.vector_store %arg7[%c0_11, %c0_12], %12 {strides = array<i32>} : memref<10x128xf32, #tpu.memory_space<vmem>>, vector<10x128xf32>,
    } else {
    }
    %c0 = arith.constant 0 : index
    %c0_1 = arith.constant 0 : index
    %3 = vector.load %arg7[%c0, %c0_1] : memref<10x128xf32, #tpu.memory_space<vmem>>, vector<10x128xf32>
    %c0_2 = arith.constant 0 : index
    %c0_3 = arith.constant 0 : index
    %4 = vector.load %arg3[%c0_2, %c0_3] : memref<10x32xbf16, #tpu.memory_space<vmem>>, vector<10x32xbf16>
    %c0_4 = arith.constant 0 : index
    %c0_5 = arith.constant 0 : index
    %5 = vector.load %arg4[%c0_4, %c0_5] : memref<32x128xbf16, #tpu.memory_space<vmem>>, vector<32x128xbf16>
    %cst = arith.constant dense<0.000000e+00> : vector<10x128xf32>
    %6 = tpu.matmul %4, %5, %cst {dimension_numbers = #tpu.dot_dimension_numbers<[1], [0], [0], [1], [0, 0, 1, 1], [], []>} : vector<10x32xbf16>, vector<32x128xbf16>, vector<10x128xf32> -> vector<10x128xf32>
    %7 = arith.addf %3, %6 : vector<10x128xf32>
    %c0_6 = arith.constant 0 : index
    %c0_7 = arith.constant 0 : index
    %8 = vector.load %arg7[%c0_6, %c0_7] : memref<10x128xf32, #tpu.memory_space<vmem>>, vector<10x128xf32>
    tpu.vector_store %arg7[%c0_6, %c0_7], %7 {strides = array<i32>} : memref<10x128xf32, #tpu.memory_space<vmem>>, vector<10x128xf32>,
    %c0_i32_8 = arith.constant 0 : i32
    %9 = arith.cmpi eq, %arg2, %c0_i32_8 : i32
    %10 = arith.extui %9 : i1 to i32
    %c0_i32_9 = arith.constant 0 : i32
    %11 = arith.cmpi ne, %10, %c0_i32_9 : i32
    scf.if %11 {
      %c0_10 = arith.constant 0 : index
      %c0_11 = arith.constant 0 : index
      %12 = vector.load %arg7[%c0_10, %c0_11] : memref<10x128xf32, #tpu.memory_space<vmem>>, vector<10x128xf32>
      %c0_12 = arith.constant 0 : index
      %c0_13 = arith.constant 0 : index
      %13 = vector.load %arg5[%c0_12, %c0_13] : memref<1x128xf32, #tpu.memory_space<vmem>>, vector<1x128xf32>
      %14 = vector.broadcast %13 : vector<1x128xf32> to vector<10x128xf32>
      %15 = arith.addf %12, %14 : vector<10x128xf32>
      %cst_14 = arith.constant 1.702000e+00 : f32
      %16 = vector.broadcast %cst_14 : f32 to vector<10x128xf32>
      %17 = arith.mulf %16, %15 : vector<10x128xf32>
      %18 = arith.negf %17 : vector<10x128xf32>
      %19 = math.exp %18 : vector<10x128xf32>
      %cst_15 = arith.constant 1.000000e+00 : f32
      %20 = vector.broadcast %cst_15 : f32 to vector<10x128xf32>
      %21 = arith.addf %20, %19 : vector<10x128xf32>
      %22 = arith.divf %20, %21 : vector<10x128xf32>
      %23 = arith.mulf %15, %22 : vector<10x128xf32>
      %24 = arith.truncf %23 : vector<10x128xf32> to vector<10x128xbf16>
      %c0_16 = arith.constant 0 : index
      %c0_17 = arith.constant 0 : index
      %25 = vector.load %arg6[%c0_16, %c0_17] : memref<10x128xbf16, #tpu.memory_space<vmem>>, vector<10x128xbf16>
      tpu.vector_store %arg6[%c0_16, %c0_17], %24 {strides = array<i32>} : memref<10x128xbf16, #tpu.memory_space<vmem>>, vector<10x128xbf16>,
    } else {
    }
    return
  }
  func.func @transform_0(%arg0: i32, %arg1: i32, %arg2: i32) -> (i32, i32) {
    %c0_i32 = arith.constant 0 : i32
    return %arg0, %arg2 : i32, i32
  }
  func.func @transform_1(%arg0: i32, %arg1: i32, %arg2: i32) -> (i32, i32) {
    %c0_i32 = arith.constant 0 : i32
    return %arg2, %arg1 : i32, i32
  }
  func.func @transform_2(%arg0: i32, %arg1: i32, %arg2: i32) -> (i32, i32) {
    %c0_i32 = arith.constant 0 : i32
    %c0_i32_0 = arith.constant 0 : i32
    return %c0_i32, %arg1 : i32, i32
  }
  func.func @transform_3(%arg0: i32, %arg1: i32, %arg2: i32) -> (i32, i32) {
    %c0_i32 = arith.constant 0 : i32
    return %arg0, %arg1 : i32, i32
  }
}

module attributes {stable_mosaic.version = 11 : i64} {
  func.func @_attention_kernel(%arg0: i32, %arg1: memref<1x5x32xbf16, #tpu.memory_space<vmem>>, %arg2: memref<1x5x32xbf16, #tpu.memory_space<vmem>>, %arg3: memref<1x5x32xbf16, #tpu.memory_space<vmem>>, %arg4: memref<1x5x32xbf16, #tpu.memory_space<vmem>>) attributes {dimension_semantics = [#tpu.dimension_semantics<parallel>], iteration_bounds = array<i64: 2>, scalar_prefetch = 0 : i64, scratch_operands = 0 : i64, tpu.core_type = #tpu.core_type<tc>, window_params = [{transform_indices = @transform_0, window_bounds = array<i64: 1, 5, 32>}, {transform_indices = @transform_1, window_bounds = array<i64: 1, 5, 32>}, {transform_indices = @transform_2, window_bounds = array<i64: 1, 5, 32>}, {transform_indices = @transform_3, window_bounds = array<i64: 1, 5, 32>}]} {
    %c0 = arith.constant 0 : index
    %c0_0 = arith.constant 0 : index
    %c0_1 = arith.constant 0 : index
    %0 = vector.load %arg1[%c0, %c0_0, %c0_1] : memref<1x5x32xbf16, #tpu.memory_space<vmem>>, vector<1x5x8xbf16>
    %1 = vector.shape_cast %0 : vector<1x5x8xbf16> to vector<5x8xbf16>
    %c0_2 = arith.constant 0 : index
    %c0_3 = arith.constant 0 : index
    %c0_4 = arith.constant 0 : index
    %2 = vector.load %arg2[%c0_2, %c0_3, %c0_4] : memref<1x5x32xbf16, #tpu.memory_space<vmem>>, vector<1x5x8xbf16>
    %3 = vector.shape_cast %2 : vector<1x5x8xbf16> to vector<5x8xbf16>
    %c0_5 = arith.constant 0 : index
    %c0_6 = arith.constant 0 : index
    %c0_7 = arith.constant 0 : index
    %4 = vector.load %arg3[%c0_5, %c0_6, %c0_7] : memref<1x5x32xbf16, #tpu.memory_space<vmem>>, vector<1x5x8xbf16>
    %5 = vector.shape_cast %4 : vector<1x5x8xbf16> to vector<5x8xbf16>
    %cst = arith.constant dense<0.000000e+00> : vector<5x5xf32>
    %6 = tpu.matmul %1, %3, %cst {dimension_numbers = #tpu.dot_dimension_numbers<[1], [1], [0], [0], [0, 0, 1, 0], [], []>} : vector<5x8xbf16>, vector<5x8xbf16>, vector<5x5xf32> -> vector<5x5xf32>
    %cst_8 = arith.constant 0.353553385 : f32
    %7 = vector.broadcast %cst_8 : f32 to vector<5x5xf32>
    %8 = arith.mulf %6, %7 : vector<5x5xf32>
    %cst_9 = arith.constant dense<0xFF800000> : vector<5xf32>
    %9 = vector.multi_reduction <maximumf>, %8, %cst_9 [1] : vector<5x5xf32> to vector<5xf32>
    %10 = vector.shape_cast %9 : vector<5xf32> to vector<5x1xf32>
    %11 = vector.broadcast %10 : vector<5x1xf32> to vector<5x5xf32>
    %12 = arith.subf %8, %11 : vector<5x5xf32>
    %13 = math.exp %12 : vector<5x5xf32>
    %cst_10 = arith.constant dense<0.000000e+00> : vector<5xf32>
    %14 = vector.multi_reduction <add>, %13, %cst_10 [1] : vector<5x5xf32> to vector<5xf32>
    %15 = vector.shape_cast %14 : vector<5xf32> to vector<5x1xf32>
    %16 = arith.truncf %13 : vector<5x5xf32> to vector<5x5xbf16>
    %cst_11 = arith.constant dense<0.000000e+00> : vector<5x8xf32>
    %17 = tpu.matmul %16, %5, %cst_11 {dimension_numbers = #tpu.dot_dimension_numbers<[1], [0], [0], [1], [0, 0, 1, 1], [], []>} : vector<5x5xbf16>, vector<5x8xbf16>, vector<5x8xf32> -> vector<5x8xf32>
    %18 = tpu.reciprocal %15 {approx = true} : vector<5x1xf32> -> vector<5x1xf32>
    %19 = vector.broadcast %18 : vector<5x1xf32> to vector<5x8xf32>
    %20 = arith.mulf %17, %19 : vector<5x8xf32>
    %21 = arith.truncf %20 : vector<5x8xf32> to vector<5x8xbf16>
    %c0_12 = arith.constant 0 : index
    %c0_13 = arith.constant 0 : index
    %c0_14 = arith.constant 0 : index
    %22 = vector.load %arg4[%c0_12, %c0_13, %c0_14] : memref<1x5x32xbf16, #tpu.memory_space<vmem>>, vector<1x5x8xbf16>
    %23 = vector.shape_cast %22 : vector<1x5x8xbf16> to vector<5x8xbf16>
    %24 = vector.shape_cast %21 : vector<5x8xbf16> to vector<1x5x8xbf16>
    tpu.vector_store %arg4[%c0_12, %c0_13, %c0_14], %24 {strides = array<i32>} : memref<1x5x32xbf16, #tpu.memory_space<vmem>>, vector<1x5x8xbf16>,
    %c0_15 = arith.constant 0 : index
    %c0_16 = arith.constant 0 : index
    %c8 = arith.constant 8 : index
    %25 = vector.load %arg1[%c0_15, %c0_16, %c8] : memref<1x5x32xbf16, #tpu.memory_space<vmem>>, vector<1x5x8xbf16>
    %26 = vector.shape_cast %25 : vector<1x5x8xbf16> to vector<5x8xbf16>
    %c0_17 = arith.constant 0 : index
    %c0_18 = arith.constant 0 : index
    %c8_19 = arith.constant 8 : index
    %27 = vector.load %arg2[%c0_17, %c0_18, %c8_19] : memref<1x5x32xbf16, #tpu.memory_space<vmem>>, vector<1x5x8xbf16>
    %28 = vector.shape_cast %27 : vector<1x5x8xbf16> to vector<5x8xbf16>
    %c0_20 = arith.constant 0 : index
    %c0_21 = arith.constant 0 : index
    %c8_22 = arith.constant 8 : index
    %29 = vector.load %arg3[%c0_20, %c0_21, %c8_22] : memref<1x5x32xbf16, #tpu.memory_space<vmem>>, vector<1x5x8xbf16>
    %30 = vector.shape_cast %29 : vector<1x5x8xbf16> to vector<5x8xbf16>
    %cst_23 = arith.constant dense<0.000000e+00> : vector<5x5xf32>
    %31 = tpu.matmul %26, %28, %cst_23 {dimension_numbers = #tpu.dot_dimension_numbers<[1], [1], [0], [0], [0, 0, 1, 0], [], []>} : vector<5x8xbf16>, vector<5x8xbf16>, vector<5x5xf32> -> vector<5x5xf32>
    %cst_24 = arith.constant 0.353553385 : f32
    %32 = vector.broadcast %cst_24 : f32 to vector<5x5xf32>
    %33 = arith.mulf %31, %32 : vector<5x5xf32>
    %cst_25 = arith.constant dense<0xFF800000> : vector<5xf32>
    %34 = vector.multi_reduction <maximumf>, %33, %cst_25 [1] : vector<5x5xf32> to vector<5xf32>
    %35 = vector.shape_cast %34 : vector<5xf32> to vector<5x1xf32>
    %36 = vector.broadcast %35 : vector<5x1xf32> to vector<5x5xf32>
    %37 = arith.subf %33, %36 : vector<5x5xf32>
    %38 = math.exp %37 : vector<5x5xf32>
    %cst_26 = arith.constant dense<0.000000e+00> : vector<5xf32>
    %39 = vector.multi_reduction <add>, %38, %cst_26 [1] : vector<5x5xf32> to vector<5xf32>
    %40 = vector.shape_cast %39 : vector<5xf32> to vector<5x1xf32>
    %41 = arith.truncf %38 : vector<5x5xf32> to vector<5x5xbf16>
    %cst_27 = arith.constant dense<0.000000e+00> : vector<5x8xf32>
    %42 = tpu.matmul %41, %30, %cst_27 {dimension_numbers = #tpu.dot_dimension_numbers<[1], [0], [0], [1], [0, 0, 1, 1], [], []>} : vector<5x5xbf16>, vector<5x8xbf16>, vector<5x8xf32> -> vector<5x8xf32>
    %43 = tpu.reciprocal %40 {approx = true} : vector<5x1xf32> -> vector<5x1xf32>
    %44 = vector.broadcast %43 : vector<5x1xf32> to vector<5x8xf32>
    %45 = arith.mulf %42, %44 : vector<5x8xf32>
    %46 = arith.truncf %45 : vector<5x8xf32> to vector<5x8xbf16>
    %c0_28 = arith.constant 0 : index
    %c0_29 = arith.constant 0 : index
    %c8_30 = arith.constant 8 : index
    %47 = vector.load %arg4[%c0_28, %c0_29, %c8_30] : memref<1x5x32xbf16, #tpu.memory_space<vmem>>, vector<1x5x8xbf16>
    %48 = vector.shape_cast %47 : vector<1x5x8xbf16> to vector<5x8xbf16>
    %49 = vector.shape_cast %46 : vector<5x8xbf16> to vector<1x5x8xbf16>
    tpu.vector_store %arg4[%c0_28, %c0_29, %c8_30], %49 {strides = array<i32>} : memref<1x5x32xbf16, #tpu.memory_space<vmem>>, vector<1x5x8xbf16>,
    %c0_31 = arith.constant 0 : index
    %c0_32 = arith.constant 0 : index
    %c16 = arith.constant 16 : index
    %50 = vector.load %arg1[%c0_31, %c0_32, %c16] : memref<1x5x32xbf16, #tpu.memory_space<vmem>>, vector<1x5x8xbf16>
    %51 = vector.shape_cast %50 : vector<1x5x8xbf16> to vector<5x8xbf16>
    %c0_33 = arith.constant 0 : index
    %c0_34 = arith.constant 0 : index
    %c16_35 = arith.constant 16 : index
    %52 = vector.load %arg2[%c0_33, %c0_34, %c16_35] : memref<1x5x32xbf16, #tpu.memory_space<vmem>>, vector<1x5x8xbf16>
    %53 = vector.shape_cast %52 : vector<1x5x8xbf16> to vector<5x8xbf16>
    %c0_36 = arith.constant 0 : index
    %c0_37 = arith.constant 0 : index
    %c16_38 = arith.constant 16 : index
    %54 = vector.load %arg3[%c0_36, %c0_37, %c16_38] : memref<1x5x32xbf16, #tpu.memory_space<vmem>>, vector<1x5x8xbf16>
    %55 = vector.shape_cast %54 : vector<1x5x8xbf16> to vector<5x8xbf16>
    %cst_39 = arith.constant dense<0.000000e+00> : vector<5x5xf32>
    %56 = tpu.matmul %51, %53, %cst_39 {dimension_numbers = #tpu.dot_dimension_numbers<[1], [1], [0], [0], [0, 0, 1, 0], [], []>} : vector<5x8xbf16>, vector<5x8xbf16>, vector<5x5xf32> -> vector<5x5xf32>
    %cst_40 = arith.constant 0.353553385 : f32
    %57 = vector.broadcast %cst_40 : f32 to vector<5x5xf32>
    %58 = arith.mulf %56, %57 : vector<5x5xf32>
    %cst_41 = arith.constant dense<0xFF800000> : vector<5xf32>
    %59 = vector.multi_reduction <maximumf>, %58, %cst_41 [1] : vector<5x5xf32> to vector<5xf32>
    %60 = vector.shape_cast %59 : vector<5xf32> to vector<5x1xf32>
    %61 = vector.broadcast %60 : vector<5x1xf32> to vector<5x5xf32>
    %62 = arith.subf %58, %61 : vector<5x5xf32>
    %63 = math.exp %62 : vector<5x5xf32>
    %cst_42 = arith.constant dense<0.000000e+00> : vector<5xf32>
    %64 = vector.multi_reduction <add>, %63, %cst_42 [1] : vector<5x5xf32> to vector<5xf32>
    %65 = vector.shape_cast %64 : vector<5xf32> to vector<5x1xf32>
    %66 = arith.truncf %63 : vector<5x5xf32> to vector<5x5xbf16>
    %cst_43 = arith.constant dense<0.000000e+00> : vector<5x8xf32>
    %67 = tpu.matmul %66, %55, %cst_43 {dimension_numbers = #tpu.dot_dimension_numbers<[1], [0], [0], [1], [0, 0, 1, 1], [], []>} : vector<5x5xbf16>, vector<5x8xbf16>, vector<5x8xf32> -> vector<5x8xf32>
    %68 = tpu.reciprocal %65 {approx = true} : vector<5x1xf32> -> vector<5x1xf32>
    %69 = vector.broadcast %68 : vector<5x1xf32> to vector<5x8xf32>
    %70 = arith.mulf %67, %69 : vector<5x8xf32>
    %71 = arith.truncf %70 : vector<5x8xf32> to vector<5x8xbf16>
    %c0_44 = arith.constant 0 : index
    %c0_45 = arith.constant 0 : index
    %c16_46 = arith.constant 16 : index
    %72 = vector.load %arg4[%c0_44, %c0_45, %c16_46] : memref<1x5x32xbf16, #tpu.memory_space<vmem>>, vector<1x5x8xbf16>
    %73 = vector.shape_cast %72 : vector<1x5x8xbf16> to vector<5x8xbf16>
    %74 = vector.shape_cast %71 : vector<5x8xbf16> to vector<1x5x8xbf16>
    tpu.vector_store %arg4[%c0_44, %c0_45, %c16_46], %74 {strides = array<i32>} : memref<1x5x32xbf16, #tpu.memory_space<vmem>>, vector<1x5x8xbf16>,
    %c0_47 = arith.constant 0 : index
    %c0_48 = arith.constant 0 : index
    %c24 = arith.constant 24 : index
    %75 = vector.load %arg1[%c0_47, %c0_48, %c24] : memref<1x5x32xbf16, #tpu.memory_space<vmem>>, vector<1x5x8xbf16>
    %76 = vector.shape_cast %75 : vector<1x5x8xbf16> to vector<5x8xbf16>
    %c0_49 = arith.constant 0 : index
    %c0_50 = arith.constant 0 : index
    %c24_51 = arith.constant 24 : index
    %77 = vector.load %arg2[%c0_49, %c0_50, %c24_51] : memref<1x5x32xbf16, #tpu.memory_space<vmem>>, vector<1x5x8xbf16>
    %78 = vector.shape_cast %77 : vector<1x5x8xbf16> to vector<5x8xbf16>
    %c0_52 = arith.constant 0 : index
    %c0_53 = arith.constant 0 : index
    %c24_54 = arith.constant 24 : index
    %79 = vector.load %arg3[%c0_52, %c0_53, %c24_54] : memref<1x5x32xbf16, #tpu.memory_space<vmem>>, vector<1x5x8xbf16>
    %80 = vector.shape_cast %79 : vector<1x5x8xbf16> to vector<5x8xbf16>
    %cst_55 = arith.constant dense<0.000000e+00> : vector<5x5xf32>
    %81 = tpu.matmul %76, %78, %cst_55 {dimension_numbers = #tpu.dot_dimension_numbers<[1], [1], [0], [0], [0, 0, 1, 0], [], []>} : vector<5x8xbf16>, vector<5x8xbf16>, vector<5x5xf32> -> vector<5x5xf32>
    %cst_56 = arith.constant 0.353553385 : f32
    %82 = vector.broadcast %cst_56 : f32 to vector<5x5xf32>
    %83 = arith.mulf %81, %82 : vector<5x5xf32>
    %cst_57 = arith.constant dense<0xFF800000> : vector<5xf32>
    %84 = vector.multi_reduction <maximumf>, %83, %cst_57 [1] : vector<5x5xf32> to vector<5xf32>
    %85 = vector.shape_cast %84 : vector<5xf32> to vector<5x1xf32>
    %86 = vector.broadcast %85 : vector<5x1xf32> to vector<5x5xf32>
    %87 = arith.subf %83, %86 : vector<5x5xf32>
    %88 = math.exp %87 : vector<5x5xf32>
    %cst_58 = arith.constant dense<0.000000e+00> : vector<5xf32>
    %89 = vector.multi_reduction <add>, %88, %cst_58 [1] : vector<5x5xf32> to vector<5xf32>
    %90 = vector.shape_cast %89 : vector<5xf32> to vector<5x1xf32>
    %91 = arith.truncf %88 : vector<5x5xf32> to vector<5x5xbf16>
    %cst_59 = arith.constant dense<0.000000e+00> : vector<5x8xf32>
    %92 = tpu.matmul %91, %80, %cst_59 {dimension_numbers = #tpu.dot_dimension_numbers<[1], [0], [0], [1], [0, 0, 1, 1], [], []>} : vector<5x5xbf16>, vector<5x8xbf16>, vector<5x8xf32> -> vector<5x8xf32>
    %93 = tpu.reciprocal %90 {approx = true} : vector<5x1xf32> -> vector<5x1xf32>
    %94 = vector.broadcast %93 : vector<5x1xf32> to vector<5x8xf32>
    %95 = arith.mulf %92, %94 : vector<5x8xf32>
    %96 = arith.truncf %95 : vector<5x8xf32> to vector<5x8xbf16>
    %c0_60 = arith.constant 0 : index
    %c0_61 = arith.constant 0 : index
    %c24_62 = arith.constant 24 : index
    %97 = vector.load %arg4[%c0_60, %c0_61, %c24_62] : memref<1x5x32xbf16, #tpu.memory_space<vmem>>, vector<1x5x8xbf16>
    %98 = vector.shape_cast %97 : vector<1x5x8xbf16> to vector<5x8xbf16>
    %99 = vector.shape_cast %96 : vector<5x8xbf16> to vector<1x5x8xbf16>
    tpu.vector_store %arg4[%c0_60, %c0_61, %c24_62], %99 {strides = array<i32>} : memref<1x5x32xbf16, #tpu.memory_space<vmem>>, vector<1x5x8xbf16>,
    return
  }
  func.func @transform_0(%arg0: i32) -> (i32, i32, i32) {
    %c0_i32 = arith.constant 0 : i32
    %c0_i32_0 = arith.constant 0 : i32
    %c0_i32_1 = arith.constant 0 : i32
    return %arg0, %c0_i32, %c0_i32_0 : i32, i32, i32
  }
  func.func @transform_1(%arg0: i32) -> (i32, i32, i32) {
    %c0_i32 = arith.constant 0 : i32
    %c0_i32_0 = arith.constant 0 : i32
    %c0_i32_1 = arith.constant 0 : i32
    return %arg0, %c0_i32, %c0_i32_0 : i32, i32, i32
  }
  func.func @transform_2(%arg0: i32) -> (i32, i32, i32) {
    %c0_i32 = arith.constant 0 : i32
    %c0_i32_0 = arith.constant 0 : i32
    %c0_i32_1 = arith.constant 0 : i32
    return %arg0, %c0_i32, %c0_i32_0 : i32, i32, i32
  }
  func.func @transform_3(%arg0: i32) -> (i32, i32, i32) {
    %c0_i32 = arith.constant 0 : i32
    %c0_i32_0 = arith.constant 0 : i32
    %c0_i32_1 = arith.constant 0 : i32
    return %arg0, %c0_i32, %c0_i32_0 : i32, i32, i32
  }
}

module attributes {stable_mosaic.version = 11 : i64} {
  func.func @_linear_kernel(%arg0: i32, %arg1: i32, %arg2: i32, %arg3: memref<10x32xbf16, #tpu.memory_space<vmem>>, %arg4: memref<32x32xbf16, #tpu.memory_space<vmem>>, %arg5: memref<1x32xf32, #tpu.memory_space<vmem>>, %arg6: memref<10x32xf32, #tpu.memory_space<vmem>>, %arg7: memref<10x32xf32, #tpu.memory_space<vmem>>, %arg8: memref<10x32xf32, #tpu.memory_space<vmem>>) attributes {dimension_semantics = [#tpu.dimension_semantics<parallel>, #tpu.dimension_semantics<parallel>, #tpu.dimension_semantics<arbitrary>], iteration_bounds = array<i64: 1, 1, 1>, scalar_prefetch = 0 : i64, scratch_operands = 1 : i64, tpu.core_type = #tpu.core_type<tc>, window_params = [{transform_indices = @transform_0, window_bounds = array<i64: 10, 32>}, {transform_indices = @transform_1, window_bounds = array<i64: 32, 32>}, {transform_indices = @transform_2, window_bounds = array<i64: 1, 32>}, {transform_indices = @transform_3, window_bounds = array<i64: 10, 32>}, {transform_indices = @transform_4, window_bounds = array<i64: 10, 32>}]} {
    %c0_i32 = arith.constant 0 : i32
    %0 = arith.cmpi eq, %arg2, %c0_i32 : i32
    %1 = arith.extui %0 : i1 to i32
    %c0_i32_0 = arith.constant 0 : i32
    %2 = arith.cmpi ne, %1, %c0_i32_0 : i32
    scf.if %2 {
      %cst_10 = arith.constant 0.000000e+00 : f32
      %12 = vector.broadcast %cst_10 : f32 to vector<10x32xf32>
      %c0_11 = arith.constant 0 : index
      %c0_12 = arith.constant 0 : index
      %13 = vector.load %arg8[%c0_11, %c0_12] : memref<10x32xf32, #tpu.memory_space<vmem>>, vector<10x32xf32>
      tpu.vector_store %arg8[%c0_11, %c0_12], %12 {strides = array<i32>} : memref<10x32xf32, #tpu.memory_space<vmem>>, vector<10x32xf32>,
    } else {
    }
    %c0 = arith.constant 0 : index
    %c0_1 = arith.constant 0 : index
    %3 = vector.load %arg8[%c0, %c0_1] : memref<10x32xf32, #tpu.memory_space<vmem>>, vector<10x32xf32>
    %c0_2 = arith.constant 0 : index
    %c0_3 = arith.constant 0 : index
    %4 = vector.load %arg3[%c0_2, %c0_3] : memref<10x32xbf16, #tpu.memory_space<vmem>>, vector<10x32xbf16>
    %c0_4 = arith.constant 0 : index
    %c0_5 = arith.constant 0 : index
    %5 = vector.load %arg4[%c0_4, %c0_5] : memref<32x32xbf16, #tpu.memory_space<vmem>>, vector<32x32xbf16>
    %cst = arith.constant dense<0.000000e+00> : vector<10x32xf32>
    %6 = tpu.matmul %4, %5, %cst {dimension_numbers = #tpu.dot_dimension_numbers<[1], [0], [0], [1], [0, 0, 1, 1], [], []>} : vector<10x32xbf16>, vector<32x32xbf16>, vector<10x32xf32> -> vector<10x32xf32>
    %7 = arith.addf %3, %6 : vector<10x32xf32>
    %c0_6 = arith.constant 0 : index
    %c0_7 = arith.constant 0 : index
    %8 = vector.load %arg8[%c0_6, %c0_7] : memref<10x32xf32, #tpu.memory_space<vmem>>, vector<10x32xf32>
    tpu.vector_store %arg8[%c0_6, %c0_7], %7 {strides = array<i32>} : memref<10x32xf32, #tpu.memory_space<vmem>>, vector<10x32xf32>,
    %c0_i32_8 = arith.constant 0 : i32
    %9 = arith.cmpi eq, %arg2, %c0_i32_8 : i32
    %10 = arith.extui %9 : i1 to i32
    %c0_i32_9 = arith.constant 0 : i32
    %11 = arith.cmpi ne, %10, %c0_i32_9 : i32
    scf.if %11 {
      %c0_10 = arith.constant 0 : index
      %c0_11 = arith.constant 0 : index
      %12 = vector.load %arg8[%c0_10, %c0_11] : memref<10x32xf32, #tpu.memory_space<vmem>>, vector<10x32xf32>
      %c0_12 = arith.constant 0 : index
      %c0_13 = arith.constant 0 : index
      %13 = vector.load %arg5[%c0_12, %c0_13] : memref<1x32xf32, #tpu.memory_space<vmem>>, vector<1x32xf32>
      %14 = vector.broadcast %13 : vector<1x32xf32> to vector<10x32xf32>
      %15 = arith.addf %12, %14 : vector<10x32xf32>
      %c0_14 = arith.constant 0 : index
      %c0_15 = arith.constant 0 : index
      %16 = vector.load %arg6[%c0_14, %c0_15] : memref<10x32xf32, #tpu.memory_space<vmem>>, vector<10x32xf32>
      %17 = arith.addf %15, %16 : vector<10x32xf32>
      %c0_16 = arith.constant 0 : index
      %c0_17 = arith.constant 0 : index
      %18 = vector.load %arg7[%c0_16, %c0_17] : memref<10x32xf32, #tpu.memory_space<vmem>>, vector<10x32xf32>
      tpu.vector_store %arg7[%c0_16, %c0_17], %17 {strides = array<i32>} : memref<10x32xf32, #tpu.memory_space<vmem>>, vector<10x32xf32>,
    } else {
    }
    return
  }
  func.func @transform_0(%arg0: i32, %arg1: i32, %arg2: i32) -> (i32, i32) {
    %c0_i32 = arith.constant 0 : i32
    return %arg0, %arg2 : i32, i32
  }
  func.func @transform_1(%arg0: i32, %arg1: i32, %arg2: i32) -> (i32, i32) {
    %c0_i32 = arith.constant 0 : i32
    return %arg2, %arg1 : i32, i32
  }
  func.func @transform_2(%arg0: i32, %arg1: i32, %arg2: i32) -> (i32, i32) {
    %c0_i32 = arith.constant 0 : i32
    %c0_i32_0 = arith.constant 0 : i32
    return %c0_i32, %arg1 : i32, i32
  }
  func.func @transform_3(%arg0: i32, %arg1: i32, %arg2: i32) -> (i32, i32) {
    %c0_i32 = arith.constant 0 : i32
    return %arg0, %arg1 : i32, i32
  }
  func.func @transform_4(%arg0: i32, %arg1: i32, %arg2: i32) -> (i32, i32) {
    %c0_i32 = arith.constant 0 : i32
    return %arg0, %arg1 : i32, i32
  }
}

module attributes {stable_mosaic.version = 11 : i64} {
  func.func @_linear_kernel(%arg0: i32, %arg1: i32, %arg2: i32, %arg3: memref<10x128xbf16, #tpu.memory_space<vmem>>, %arg4: memref<128x32xbf16, #tpu.memory_space<vmem>>, %arg5: memref<1x32xf32, #tpu.memory_space<vmem>>, %arg6: memref<10x32xf32, #tpu.memory_space<vmem>>, %arg7: memref<10x32xf32, #tpu.memory_space<vmem>>, %arg8: memref<10x32xf32, #tpu.memory_space<vmem>>) attributes {dimension_semantics = [#tpu.dimension_semantics<parallel>, #tpu.dimension_semantics<parallel>, #tpu.dimension_semantics<arbitrary>], iteration_bounds = array<i64: 1, 1, 1>, scalar_prefetch = 0 : i64, scratch_operands = 1 : i64, tpu.core_type = #tpu.core_type<tc>, window_params = [{transform_indices = @transform_0, window_bounds = array<i64: 10, 128>}, {transform_indices = @transform_1, window_bounds = array<i64: 128, 32>}, {transform_indices = @transform_2, window_bounds = array<i64: 1, 32>}, {transform_indices = @transform_3, window_bounds = array<i64: 10, 32>}, {transform_indices = @transform_4, window_bounds = array<i64: 10, 32>}]} {
    %c0_i32 = arith.constant 0 : i32
    %0 = arith.cmpi eq, %arg2, %c0_i32 : i32
    %1 = arith.extui %0 : i1 to i32
    %c0_i32_0 = arith.constant 0 : i32
    %2 = arith.cmpi ne, %1, %c0_i32_0 : i32
    scf.if %2 {
      %cst_10 = arith.constant 0.000000e+00 : f32
      %12 = vector.broadcast %cst_10 : f32 to vector<10x32xf32>
      %c0_11 = arith.constant 0 : index
      %c0_12 = arith.constant 0 : index
      %13 = vector.load %arg8[%c0_11, %c0_12] : memref<10x32xf32, #tpu.memory_space<vmem>>, vector<10x32xf32>
      tpu.vector_store %arg8[%c0_11, %c0_12], %12 {strides = array<i32>} : memref<10x32xf32, #tpu.memory_space<vmem>>, vector<10x32xf32>,
    } else {
    }
    %c0 = arith.constant 0 : index
    %c0_1 = arith.constant 0 : index
    %3 = vector.load %arg8[%c0, %c0_1] : memref<10x32xf32, #tpu.memory_space<vmem>>, vector<10x32xf32>
    %c0_2 = arith.constant 0 : index
    %c0_3 = arith.constant 0 : index
    %4 = vector.load %arg3[%c0_2, %c0_3] : memref<10x128xbf16, #tpu.memory_space<vmem>>, vector<10x128xbf16>
    %c0_4 = arith.constant 0 : index
    %c0_5 = arith.constant 0 : index
    %5 = vector.load %arg4[%c0_4, %c0_5] : memref<128x32xbf16, #tpu.memory_space<vmem>>, vector<128x32xbf16>
    %cst = arith.constant dense<0.000000e+00> : vector<10x32xf32>
    %6 = tpu.matmul %4, %5, %cst {dimension_numbers = #tpu.dot_dimension_numbers<[1], [0], [0], [1], [0, 0, 1, 1], [], []>} : vector<10x128xbf16>, vector<128x32xbf16>, vector<10x32xf32> -> vector<10x32xf32>
    %7 = arith.addf %3, %6 : vector<10x32xf32>
    %c0_6 = arith.constant 0 : index
    %c0_7 = arith.constant 0 : index
    %8 = vector.load %arg8[%c0_6, %c0_7] : memref<10x32xf32, #tpu.memory_space<vmem>>, vector<10x32xf32>
    tpu.vector_store %arg8[%c0_6, %c0_7], %7 {strides = array<i32>} : memref<10x32xf32, #tpu.memory_space<vmem>>, vector<10x32xf32>,
    %c0_i32_8 = arith.constant 0 : i32
    %9 = arith.cmpi eq, %arg2, %c0_i32_8 : i32
    %10 = arith.extui %9 : i1 to i32
    %c0_i32_9 = arith.constant 0 : i32
    %11 = arith.cmpi ne, %10, %c0_i32_9 : i32
    scf.if %11 {
      %c0_10 = arith.constant 0 : index
      %c0_11 = arith.constant 0 : index
      %12 = vector.load %arg8[%c0_10, %c0_11] : memref<10x32xf32, #tpu.memory_space<vmem>>, vector<10x32xf32>
      %c0_12 = arith.constant 0 : index
      %c0_13 = arith.constant 0 : index
      %13 = vector.load %arg5[%c0_12, %c0_13] : memref<1x32xf32, #tpu.memory_space<vmem>>, vector<1x32xf32>
      %14 = vector.broadcast %13 : vector<1x32xf32> to vector<10x32xf32>
      %15 = arith.addf %12, %14 : vector<10x32xf32>
      %c0_14 = arith.constant 0 : index
      %c0_15 = arith.constant 0 : index
      %16 = vector.load %arg6[%c0_14, %c0_15] : memref<10x32xf32, #tpu.memory_space<vmem>>, vector<10x32xf32>
      %17 = arith.addf %15, %16 : vector<10x32xf32>
      %c0_16 = arith.constant 0 : index
      %c0_17 = arith.constant 0 : index
      %18 = vector.load %arg7[%c0_16, %c0_17] : memref<10x32xf32, #tpu.memory_space<vmem>>, vector<10x32xf32>
      tpu.vector_store %arg7[%c0_16, %c0_17], %17 {strides = array<i32>} : memref<10x32xf32, #tpu.memory_space<vmem>>, vector<10x32xf32>,
    } else {
    }
    return
  }
  func.func @transform_0(%arg0: i32, %arg1: i32, %arg2: i32) -> (i32, i32) {
    %c0_i32 = arith.constant 0 : i32
    return %arg0, %arg2 : i32, i32
  }
  func.func @transform_1(%arg0: i32, %arg1: i32, %arg2: i32) -> (i32, i32) {
    %c0_i32 = arith.constant 0 : i32
    return %arg2, %arg1 : i32, i32
  }
  func.func @transform_2(%arg0: i32, %arg1: i32, %arg2: i32) -> (i32, i32) {
    %c0_i32 = arith.constant 0 : i32
    %c0_i32_0 = arith.constant 0 : i32
    return %c0_i32, %arg1 : i32, i32
  }
  func.func @transform_3(%arg0: i32, %arg1: i32, %arg2: i32) -> (i32, i32) {
    %c0_i32 = arith.constant 0 : i32
    return %arg0, %arg1 : i32, i32
  }
  func.func @transform_4(%arg0: i32, %arg1: i32, %arg2: i32) -> (i32, i32) {
    %c0_i32 = arith.constant 0 : i32
    return %arg0, %arg1 : i32, i32
  }
}

module attributes {stable_mosaic.version = 11 : i64} {
  func.func @_linear_kernel(%arg0: i32, %arg1: i32, %arg2: i32, %arg3: memref<2x32xbf16, #tpu.memory_space<vmem>>, %arg4: memref<32x16xbf16, #tpu.memory_space<vmem>>, %arg5: memref<2x16xbf16, #tpu.memory_space<vmem>>, %arg6: memref<2x16xf32, #tpu.memory_space<vmem>>) attributes {dimension_semantics = [#tpu.dimension_semantics<parallel>, #tpu.dimension_semantics<parallel>, #tpu.dimension_semantics<arbitrary>], iteration_bounds = array<i64: 1, 1, 1>, scalar_prefetch = 0 : i64, scratch_operands = 1 : i64, tpu.core_type = #tpu.core_type<tc>, window_params = [{transform_indices = @transform_0, window_bounds = array<i64: 2, 32>}, {transform_indices = @transform_1, window_bounds = array<i64: 32, 16>}, {transform_indices = @transform_2, window_bounds = array<i64: 2, 16>}]} {
    %c0_i32 = arith.constant 0 : i32
    %0 = arith.cmpi eq, %arg2, %c0_i32 : i32
    %1 = arith.extui %0 : i1 to i32
    %c0_i32_0 = arith.constant 0 : i32
    %2 = arith.cmpi ne, %1, %c0_i32_0 : i32
    scf.if %2 {
      %cst_10 = arith.constant 0.000000e+00 : f32
      %12 = vector.broadcast %cst_10 : f32 to vector<2x16xf32>
      %c0_11 = arith.constant 0 : index
      %c0_12 = arith.constant 0 : index
      %13 = vector.load %arg6[%c0_11, %c0_12] : memref<2x16xf32, #tpu.memory_space<vmem>>, vector<2x16xf32>
      tpu.vector_store %arg6[%c0_11, %c0_12], %12 {strides = array<i32>} : memref<2x16xf32, #tpu.memory_space<vmem>>, vector<2x16xf32>,
    } else {
    }
    %c0 = arith.constant 0 : index
    %c0_1 = arith.constant 0 : index
    %3 = vector.load %arg6[%c0, %c0_1] : memref<2x16xf32, #tpu.memory_space<vmem>>, vector<2x16xf32>
    %c0_2 = arith.constant 0 : index
    %c0_3 = arith.constant 0 : index
    %4 = vector.load %arg3[%c0_2, %c0_3] : memref<2x32xbf16, #tpu.memory_space<vmem>>, vector<2x32xbf16>
    %c0_4 = arith.constant 0 : index
    %c0_5 = arith.constant 0 : index
    %5 = vector.load %arg4[%c0_4, %c0_5] : memref<32x16xbf16, #tpu.memory_space<vmem>>, vector<32x16xbf16>
    %cst = arith.constant dense<0.000000e+00> : vector<2x16xf32>
    %6 = tpu.matmul %4, %5, %cst {dimension_numbers = #tpu.dot_dimension_numbers<[1], [0], [0], [1], [0, 0, 1, 1], [], []>} : vector<2x32xbf16>, vector<32x16xbf16>, vector<2x16xf32> -> vector<2x16xf32>
    %7 = arith.addf %3, %6 : vector<2x16xf32>
    %c0_6 = arith.constant 0 : index
    %c0_7 = arith.constant 0 : index
    %8 = vector.load %arg6[%c0_6, %c0_7] : memref<2x16xf32, #tpu.memory_space<vmem>>, vector<2x16xf32>
    tpu.vector_store %arg6[%c0_6, %c0_7], %7 {strides = array<i32>} : memref<2x16xf32, #tpu.memory_space<vmem>>, vector<2x16xf32>,
    %c0_i32_8 = arith.constant 0 : i32
    %9 = arith.cmpi eq, %arg2, %c0_i32_8 : i32
    %10 = arith.extui %9 : i1 to i32
    %c0_i32_9 = arith.constant 0 : i32
    %11 = arith.cmpi ne, %10, %c0_i32_9 : i32
    scf.if %11 {
      %c0_10 = arith.constant 0 : index
      %c0_11 = arith.constant 0 : index
      %12 = vector.load %arg6[%c0_10, %c0_11] : memref<2x16xf32, #tpu.memory_space<vmem>>, vector<2x16xf32>
      %13 = arith.truncf %12 : vector<2x16xf32> to vector<2x16xbf16>
      %c0_12 = arith.constant 0 : index
      %c0_13 = arith.constant 0 : index
      %14 = vector.load %arg5[%c0_12, %c0_13] : memref<2x16xbf16, #tpu.memory_space<vmem>>, vector<2x16xbf16>
      tpu.vector_store %arg5[%c0_12, %c0_13], %13 {strides = array<i32>} : memref<2x16xbf16, #tpu.memory_space<vmem>>, vector<2x16xbf16>,
    } else {
    }
    return
  }
  func.func @transform_0(%arg0: i32, %arg1: i32, %arg2: i32) -> (i32, i32) {
    %c0_i32 = arith.constant 0 : i32
    return %arg0, %arg2 : i32, i32
  }
  func.func @transform_1(%arg0: i32, %arg1: i32, %arg2: i32) -> (i32, i32) {
    %c0_i32 = arith.constant 0 : i32
    return %arg2, %arg1 : i32, i32
  }
  func.func @transform_2(%arg0: i32, %arg1: i32, %arg2: i32) -> (i32, i32) {
    %c0_i32 = arith.constant 0 : i32
    return %arg0, %arg1 : i32, i32
  }
}

module attributes {stable_mosaic.version = 11 : i64} {
  func.func @_layernorm_kernel(%arg0: i32, %arg1: memref<2x32xf32, #tpu.memory_space<vmem>>, %arg2: memref<1x32xf32, #tpu.memory_space<vmem>>, %arg3: memref<1x32xf32, #tpu.memory_space<vmem>>, %arg4: memref<2x32xbf16, #tpu.memory_space<vmem>>) attributes {dimension_semantics = [#tpu.dimension_semantics<parallel>], iteration_bounds = array<i64: 1>, scalar_prefetch = 0 : i64, scratch_operands = 0 : i64, tpu.core_type = #tpu.core_type<tc>, window_params = [{transform_indices = @transform_0, window_bounds = array<i64: 2, 32>}, {pipeline_mode = #tpu.pipeline_mode<synchronous>, transform_indices = @transform_1, window_bounds = array<i64: 1, 32>}, {pipeline_mode = #tpu.pipeline_mode<synchronous>, transform_indices = @transform_2, window_bounds = array<i64: 1, 32>}, {transform_indices = @transform_3, window_bounds = array<i64: 2, 32>}]} {
    %c0 = arith.constant 0 : index
    %c0_0 = arith.constant 0 : index
    %0 = vector.load %arg1[%c0, %c0_0] : memref<2x32xf32, #tpu.memory_space<vmem>>, vector<2x32xf32>
    %cst = arith.constant dense<0.000000e+00> : vector<2xf32>
    %1 = vector.multi_reduction <add>, %0, %cst [1] : vector<2x32xf32> to vector<2xf32>
    %2 = vector.shape_cast %1 : vector<2xf32> to vector<2x1xf32>
    %cst_1 = arith.constant 3.200000e+01 : f32
    %3 = vector.broadcast %cst_1 : f32 to vector<2x1xf32>
    %4 = arith.divf %2, %3 : vector<2x1xf32>
    %5 = vector.broadcast %4 : vector<2x1xf32> to vector<2x32xf32>
    %6 = arith.subf %0, %5 : vector<2x32xf32>
    %7 = arith.mulf %6, %6 : vector<2x32xf32>
    %cst_2 = arith.constant dense<0.000000e+00> : vector<2xf32>
    %8 = vector.multi_reduction <add>, %7, %cst_2 [1] : vector<2x32xf32> to vector<2xf32>
    %9 = vector.shape_cast %8 : vector<2xf32> to vector<2x1xf32>
    %cst_3 = arith.constant 3.200000e+01 : f32
    %10 = vector.broadcast %cst_3 : f32 to vector<2x1xf32>
    %11 = arith.divf %9, %10 : vector<2x1xf32>
    %12 = vector.broadcast %4 : vector<2x1xf32> to vector<2x32xf32>
    %13 = arith.subf %0, %12 : vector<2x32xf32>
    %cst_4 = arith.constant 9.99999974E-6 : f32
    %14 = vector.broadcast %cst_4 : f32 to vector<2x1xf32>
    %15 = arith.addf %11, %14 : vector<2x1xf32>
    %16 = math.rsqrt %15 : vector<2x1xf32>
    %17 = vector.broadcast %16 : vector<2x1xf32> to vector<2x32xf32>
    %18 = arith.mulf %13, %17 : vector<2x32xf32>
    %c0_5 = arith.constant 0 : index
    %c0_6 = arith.constant 0 : index
    %19 = vector.load %arg2[%c0_5, %c0_6] : memref<1x32xf32, #tpu.memory_space<vmem>>, vector<1x32xf32>
    %20 = vector.broadcast %19 : vector<1x32xf32> to vector<2x32xf32>
    %21 = arith.mulf %18, %20 : vector<2x32xf32>
    %c0_7 = arith.constant 0 : index
    %c0_8 = arith.constant 0 : index
    %22 = vector.load %arg3[%c0_7, %c0_8] : memref<1x32xf32, #tpu.memory_space<vmem>>, vector<1x32xf32>
    %23 = vector.broadcast %22 : vector<1x32xf32> to vector<2x32xf32>
    %24 = arith.addf %21, %23 : vector<2x32xf32>
    %25 = arith.truncf %24 : vector<2x32xf32> to vector<2x32xbf16>
    %c0_9 = arith.constant 0 : index
    %c0_10 = arith.constant 0 : index
    %26 = vector.load %arg4[%c0_9, %c0_10] : memref<2x32xbf16, #tpu.memory_space<vmem>>, vector<2x32xbf16>
    tpu.vector_store %arg4[%c0_9, %c0_10], %25 {strides = array<i32>} : memref<2x32xbf16, #tpu.memory_space<vmem>>, vector<2x32xbf16>,
    return
  }
  func.func @transform_0(%arg0: i32) -> (i32, i32) {
    %c0_i32 = arith.constant 0 : i32
    %c0_i32_0 = arith.constant 0 : i32
    return %arg0, %c0_i32 : i32, i32
  }
  func.func @transform_1(%arg0: i32) -> (i32, i32) {
    %c0_i32 = arith.constant 0 : i32
    %c0_i32_0 = arith.constant 0 : i32
    %c0_i32_1 = arith.constant 0 : i32
    return %c0_i32, %c0_i32_0 : i32, i32
  }
  func.func @transform_2(%arg0: i32) -> (i32, i32) {
    %c0_i32 = arith.constant 0 : i32
    %c0_i32_0 = arith.constant 0 : i32
    %c0_i32_1 = arith.constant 0 : i32
    return %c0_i32, %c0_i32_0 : i32, i32
  }
  func.func @transform_3(%arg0: i32) -> (i32, i32) {
    %c0_i32 = arith.constant 0 : i32
    %c0_i32_0 = arith.constant 0 : i32
    return %arg0, %c0_i32 : i32, i32
  }
}

module attributes {stable_mosaic.version = 11 : i64} {
  func.func @_linear_kernel(%arg0: i32, %arg1: i32, %arg2: i32, %arg3: memref<2x16xbf16, #tpu.memory_space<vmem>>, %arg4: memref<16x10xbf16, #tpu.memory_space<vmem>>, %arg5: memref<1x10xf32, #tpu.memory_space<vmem>>, %arg6: memref<2x10xf32, #tpu.memory_space<vmem>>, %arg7: memref<2x10xf32, #tpu.memory_space<vmem>>) attributes {dimension_semantics = [#tpu.dimension_semantics<parallel>, #tpu.dimension_semantics<parallel>, #tpu.dimension_semantics<arbitrary>], iteration_bounds = array<i64: 1, 1, 1>, scalar_prefetch = 0 : i64, scratch_operands = 1 : i64, tpu.core_type = #tpu.core_type<tc>, window_params = [{transform_indices = @transform_0, window_bounds = array<i64: 2, 16>}, {transform_indices = @transform_1, window_bounds = array<i64: 16, 10>}, {transform_indices = @transform_2, window_bounds = array<i64: 1, 10>}, {transform_indices = @transform_3, window_bounds = array<i64: 2, 10>}]} {
    %c0_i32 = arith.constant 0 : i32
    %0 = arith.cmpi eq, %arg2, %c0_i32 : i32
    %1 = arith.extui %0 : i1 to i32
    %c0_i32_0 = arith.constant 0 : i32
    %2 = arith.cmpi ne, %1, %c0_i32_0 : i32
    scf.if %2 {
      %cst_10 = arith.constant 0.000000e+00 : f32
      %12 = vector.broadcast %cst_10 : f32 to vector<2x10xf32>
      %c0_11 = arith.constant 0 : index
      %c0_12 = arith.constant 0 : index
      %13 = vector.load %arg7[%c0_11, %c0_12] : memref<2x10xf32, #tpu.memory_space<vmem>>, vector<2x10xf32>
      tpu.vector_store %arg7[%c0_11, %c0_12], %12 {strides = array<i32>} : memref<2x10xf32, #tpu.memory_space<vmem>>, vector<2x10xf32>,
    } else {
    }
    %c0 = arith.constant 0 : index
    %c0_1 = arith.constant 0 : index
    %3 = vector.load %arg7[%c0, %c0_1] : memref<2x10xf32, #tpu.memory_space<vmem>>, vector<2x10xf32>
    %c0_2 = arith.constant 0 : index
    %c0_3 = arith.constant 0 : index
    %4 = vector.load %arg3[%c0_2, %c0_3] : memref<2x16xbf16, #tpu.memory_space<vmem>>, vector<2x16xbf16>
    %c0_4 = arith.constant 0 : index
    %c0_5 = arith.constant 0 : index
    %5 = vector.load %arg4[%c0_4, %c0_5] : memref<16x10xbf16, #tpu.memory_space<vmem>>, vector<16x10xbf16>
    %cst = arith.constant dense<0.000000e+00> : vector<2x10xf32>
    %6 = tpu.matmul %4, %5, %cst {dimension_numbers = #tpu.dot_dimension_numbers<[1], [0], [0], [1], [0, 0, 1, 1], [], []>} : vector<2x16xbf16>, vector<16x10xbf16>, vector<2x10xf32> -> vector<2x10xf32>
    %7 = arith.addf %3, %6 : vector<2x10xf32>
    %c0_6 = arith.constant 0 : index
    %c0_7 = arith.constant 0 : index
    %8 = vector.load %arg7[%c0_6, %c0_7] : memref<2x10xf32, #tpu.memory_space<vmem>>, vector<2x10xf32>
    tpu.vector_store %arg7[%c0_6, %c0_7], %7 {strides = array<i32>} : memref<2x10xf32, #tpu.memory_space<vmem>>, vector<2x10xf32>,
    %c0_i32_8 = arith.constant 0 : i32
    %9 = arith.cmpi eq, %arg2, %c0_i32_8 : i32
    %10 = arith.extui %9 : i1 to i32
    %c0_i32_9 = arith.constant 0 : i32
    %11 = arith.cmpi ne, %10, %c0_i32_9 : i32
    scf.if %11 {
      %c0_10 = arith.constant 0 : index
      %c0_11 = arith.constant 0 : index
      %12 = vector.load %arg7[%c0_10, %c0_11] : memref<2x10xf32, #tpu.memory_space<vmem>>, vector<2x10xf32>
      %c0_12 = arith.constant 0 : index
      %c0_13 = arith.constant 0 : index
      %13 = vector.load %arg5[%c0_12, %c0_13] : memref<1x10xf32, #tpu.memory_space<vmem>>, vector<1x10xf32>
      %14 = vector.broadcast %13 : vector<1x10xf32> to vector<2x10xf32>
      %15 = arith.addf %12, %14 : vector<2x10xf32>
      %c0_14 = arith.constant 0 : index
      %c0_15 = arith.constant 0 : index
      %16 = vector.load %arg6[%c0_14, %c0_15] : memref<2x10xf32, #tpu.memory_space<vmem>>, vector<2x10xf32>
      tpu.vector_store %arg6[%c0_14, %c0_15], %15 {strides = array<i32>} : memref<2x10xf32, #tpu.memory_space<vmem>>, vector<2x10xf32>,
    } else {
    }
    return
  }
  func.func @transform_0(%arg0: i32, %arg1: i32, %arg2: i32) -> (i32, i32) {
    %c0_i32 = arith.constant 0 : i32
    return %arg0, %arg2 : i32, i32
  }
  func.func @transform_1(%arg0: i32, %arg1: i32, %arg2: i32) -> (i32, i32) {
    %c0_i32 = arith.constant 0 : i32
    return %arg2, %arg1 : i32, i32
  }
  func.func @transform_2(%arg0: i32, %arg1: i32, %arg2: i32) -> (i32, i32) {
    %c0_i32 = arith.constant 0 : i32
    %c0_i32_0 = arith.constant 0 : i32
    return %c0_i32, %arg1 : i32, i32
  }
  func.func @transform_3(%arg0: i32, %arg1: i32, %arg2: i32) -> (i32, i32) {
    %c0_i32 = arith.constant 0 : i32
    return %arg0, %arg1 : i32, i32
  }
}

</mosaic_0001>

<bundles_post_ra>
// kernel: vit_clip_forward.26
= control target key start
LH: loop header
LB: loop body
LE: loop exit
PB: predicated region body
PF: predicated region fallthrough
CT: control target
= control target key end

     0   :  { %vm19_vm0 = vcmask 261120   ;;  %v153_v0 = vmov 0.0   ;;  %vm154_vm1 = vmmov 0   ;;  %vm21_vm2 = vcmask 254976   ;;  %s196_s1 = inlined_call_operand.vmem [shape: bf16[32,32], index: 1, kind: input, shape index: {}]   ;;  %s197_s0 = inlined_call_operand.vmem [shape: bf16[10,32], index: 0, kind: input, shape index: {}]   ;;  %s198_s2 = inlined_call_operand.vmem [shape: f32[1,32], index: 2, kind: input, shape index: {}]   ;;  %s199_s3 = inlined_call_operand.vmem [shape: bf16[10,32], index: 3, kind: output, shape index: {}]  }
   0x1   :  { %140 = vmatprep.subr.bf16.mxu0 %v153_v0  ;;  %v150_v1 = vld [vmem:[%s196_s1] sm:$0xff]   ;;  %144 = vmatprep.mubr.msk.bf16.mxu0 %vm154_vm1, %v153_v0  ;;  %20 = vst.msk [vmem:[#allocation2] sm:$0xff] %vm19_vm0, %v153_v0  ;;  %v151_v2 = vld [vmem:[%s196_s1 + $0x8] sm:$0xff]   ;;  %vm120_vm3 = vcmask 257024   ;;  %vm122_vm4 = vcmask 253952  }
   0x2   :  { %141 = vmatpush3.bf16.msra.mxu0 %v150_v1  ;;  %v152_v3 = vld [vmem:[%s197_s0] sm:$0x1f]   ;;  %22 = vst.msk [vmem:[#allocation2 + $0x8] sm:$0x3] %vm21_vm2, %v153_v0 }
   0x3   :  { %142 = vmatprep.subr.bf16.mxu0 %v153_v0  ;;  %v132_v12 = vld [vmem:[%s198_s2] ss:$0 sm:$0xff] }
   0x6   :  { %143 = vmatpush3.bf16.msra.mxu0 %v151_v2 }
   0x8   :  { %v23_v4 = vld [vmem:[#allocation2] sm:$0xff] }
   0x9   :  { %145 = vmatmul.mubr.msk.bf16.vlgmr.msra.gmra.mrb[0].mxu0 %vm19_vm0, %v152_v3  ;;  %v24_v6 = vld [vmem:[#allocation2 + $0x8] sm:$0x3] }
  0xdc   :  { %v86_v5 = vpop.f32.mrb[0].mxu0 }
  0xdd   :  { %v93_v7 = vadd.f32 %v86_v5, %v23_v4  ;;  %v146_v8 = vpop.f32.mrb[1].mxu0 }
  0xde   :  { %v89_v9 = vpop.f32.mrb[2].mxu0 }
  0xdf   :  { %95 = vst.msk [vmem:[#allocation2] sm:$0xff] %vm19_vm0, %v93_v7  ;;  %v94_v10 = vadd.f32 %v89_v9, %v24_v6  ;;  %v147_v11 = vpop.f32.mrb[3].mxu0 }
  0xe1   :  { %97 = vst.msk [vmem:[#allocation2 + $0x8] sm:$0x3] %vm21_vm2, %v94_v10 }
  0xe6   :  { %v101_v13 = vld [vmem:[#allocation2] sm:$0xff] }
  0xe7   :  { %v110_v14 = vadd.f32 %v132_v12, %v101_v13 }
  0xe8   :  { %v102_v15 = vld [vmem:[#allocation2 + $0x8] sm:$0x3] }
  0xe9   :  { %v135_v16 = vpack.c.bf16 %v110_v14, %v110_v14  ;;  %v111_v17 = vadd.f32 %v132_v12, %v102_v15 }
  0xeb   :  { %121 = vst.msk [vmem:[%s199_s3] sm:$0xf] %vm120_vm3, %v135_v16  ;;  %v136_v18 = vpack.c.bf16 %v111_v17, %v111_v17 }
  0xed   :  { %123 = vst.msk [vmem:[%s199_s3 + $0x4] sm:$0x1] %vm122_vm4, %v136_v18 }

// kernel: vit_clip_forward.24
= control target key start
LH: loop header
LB: loop body
LE: loop exit
PB: predicated region body
PF: predicated region fallthrough
CT: control target
= control target key end

     0   :  { %vm16_vm0 = vcmask 261120   ;;  %vm20_vm1 = vcmask 254976   ;;  %s119_s0 = inlined_call_operand.vmem [shape: f32[10,32], index: 0, kind: input, shape index: {}]   ;;  %s120_s1 = inlined_call_operand.vmem [shape: f32[1,32], index: 1, kind: input, shape index: {}]   ;;  %s121_s2 = inlined_call_operand.vmem [shape: f32[1,32], index: 2, kind: input, shape index: {}]   ;;  %s122_s3 = inlined_call_operand.vmem [shape: f32[10,32], index: 3, kind: output, shape index: {}]  }
   0x1   :  { %v14_v0 = vld [vmem:[%s119_s0] sm:$0xff]  ;;  %v15_v1 = vld [vmem:[%s119_s0 + $0x8] sm:$0x3] }
   0x2   :  { %v17_v2 = vsel %vm16_vm0, %v14_v0, 0.0  ;;  %v21_v3 = vsel %vm20_vm1, %v15_v1, 0.0  ;;  %v69_v21 = vld [vmem:[%s120_s1] ss:$0 sm:$0xff] }
   0x3   :  { %18 = vadd.xlane.f32.xlu0 %v17_v2  ;;  %v70_v23 = vld [vmem:[%s121_s2] ss:$0 sm:$0xff] }
   0x7   :  { %22 = vadd.xlane.f32.xlu0 %v21_v3 }
  0x90   :  { %v19_v4 = vpop.xlane.xlu0 %18 }
  0x91   :  { %v25_v5 = vmul.f32 0.03125, %v19_v4 }
  0x93   :  { %v27_v6 = vsub.f32 %v14_v0, %v25_v5 }
  0x94   :  { %v23_v7 = vpop.xlane.xlu0 %22 }
  0x95   :  { %v26_v8 = vmul.f32 0.03125, %v23_v7  ;;  %v29_v9 = vmul.f32 %v27_v6, %v27_v6 }
  0x97   :  { %v28_v10 = vsub.f32 %v15_v1, %v26_v8  ;;  %v31_v11 = vsel %vm16_vm0, %v29_v9, 0.0 }
  0x98   :  { %32 = vadd.xlane.f32.xlu1 %v31_v11 }
  0x99   :  { %v30_v12 = vmul.f32 %v28_v10, %v28_v10 }
  0x9b   :  { %v34_v13 = vsel %vm20_vm1, %v30_v12, 0.0 }
  0x9c   :  { %35 = vadd.xlane.f32.xlu1 %v34_v13 }
 0x125   :  { %v33_v14 = vpop.xlane.xlu1 %32 }
 0x126   :  { %v37_v15 = vmul.f32 0.03125, %v33_v14 }
 0x128   :  { %v39_v16 = vadd.f32 1e-05, %v37_v15 }
 0x129   :  { %v36_v17 = vpop.xlane.xlu1 %35 }
 0x12a   :  { %71 = vrsqrt.f32 %v39_v16  ;;  %v38_v18 = vmul.f32 0.03125, %v36_v17 }
 0x12c   :  { %v40_v19 = vadd.f32 1e-05, %v38_v18 }
 0x12e   :  { %73 = vrsqrt.f32 %v40_v19 }
 0x134   :  { %v72_v20 = vpop.eup %71 }
 0x135   :  { %v43_v22 = vmul.f32 %v72_v20, %v27_v6 }
 0x137   :  { %v52_v24 = vmul.f32 %v69_v21, %v43_v22 }
 0x138   :  { %v74_v25 = vpop.eup %73 }
 0x139   :  { %v61_v26 = vadd.f32 %v70_v23, %v52_v24  ;;  %v44_v27 = vmul.f32 %v74_v25, %v28_v10 }
 0x13b   :  { %63 = vst.msk [vmem:[%s122_s3] sm:$0xff] %vm16_vm0, %v61_v26  ;;  %v53_v28 = vmul.f32 %v69_v21, %v44_v27 }
 0x13d   :  { %v62_v29 = vadd.f32 %v70_v23, %v53_v28 }
 0x13f   :  { %64 = vst.msk [vmem:[%s122_s3 + $0x8] sm:$0x3] %vm20_vm1, %v62_v29 }

// kernel: vit_clip_forward.25
= control target key start
LH: loop header
LB: loop body
LE: loop exit
PB: predicated region body
PF: predicated region fallthrough
CT: control target
= control target key end

     0   :  { %vm16_vm0 = vcmask 261120   ;;  %vm20_vm1 = vcmask 254976   ;;  %vm71_vm2 = vcmask 257024   ;;  %vm73_vm3 = vcmask 253952   ;;  %s127_s0 = inlined_call_operand.vmem [shape: f32[10,32], index: 0, kind: input, shape index: {}]   ;;  %s128_s1 = inlined_call_operand.vmem [shape: f32[1,32], index: 1, kind: input, shape index: {}]   ;;  %s129_s2 = inlined_call_operand.vmem [shape: f32[1,32], index: 2, kind: input, shape index: {}]   ;;  %s130_s3 = inlined_call_operand.vmem [shape: bf16[10,32], index: 3, kind: output, shape index: {}]  }
   0x1   :  { %v14_v0 = vld [vmem:[%s127_s0] sm:$0xff]  ;;  %v15_v1 = vld [vmem:[%s127_s0 + $0x8] sm:$0x3] }
   0x2   :  { %v17_v2 = vsel %vm16_vm0, %v14_v0, 0.0  ;;  %v21_v3 = vsel %vm20_vm1, %v15_v1, 0.0  ;;  %v79_v21 = vld [vmem:[%s128_s1] ss:$0 sm:$0xff] }
   0x3   :  { %18 = vadd.xlane.f32.xlu0 %v17_v2  ;;  %v80_v23 = vld [vmem:[%s129_s2] ss:$0 sm:$0xff] }
   0x7   :  { %22 = vadd.xlane.f32.xlu0 %v21_v3 }
  0x90   :  { %v19_v4 = vpop.xlane.xlu0 %18 }
  0x91   :  { %v25_v5 = vmul.f32 0.03125, %v19_v4 }
  0x93   :  { %v27_v6 = vsub.f32 %v14_v0, %v25_v5 }
  0x94   :  { %v23_v7 = vpop.xlane.xlu0 %22 }
  0x95   :  { %v26_v8 = vmul.f32 0.03125, %v23_v7  ;;  %v29_v9 = vmul.f32 %v27_v6, %v27_v6 }
  0x97   :  { %v28_v10 = vsub.f32 %v15_v1, %v26_v8  ;;  %v31_v11 = vsel %vm16_vm0, %v29_v9, 0.0 }
  0x98   :  { %32 = vadd.xlane.f32.xlu1 %v31_v11 }
  0x99   :  { %v30_v12 = vmul.f32 %v28_v10, %v28_v10 }
  0x9b   :  { %v34_v13 = vsel %vm20_vm1, %v30_v12, 0.0 }
  0x9c   :  { %35 = vadd.xlane.f32.xlu1 %v34_v13 }
 0x125   :  { %v33_v14 = vpop.xlane.xlu1 %32 }
 0x126   :  { %v37_v15 = vmul.f32 0.03125, %v33_v14 }
 0x128   :  { %v39_v16 = vadd.f32 1e-05, %v37_v15 }
 0x129   :  { %v36_v17 = vpop.xlane.xlu1 %35 }
 0x12a   :  { %85 = vrsqrt.f32 %v39_v16  ;;  %v38_v18 = vmul.f32 0.03125, %v36_v17 }
 0x12c   :  { %v40_v19 = vadd.f32 1e-05, %v38_v18 }
 0x12e   :  { %87 = vrsqrt.f32 %v40_v19 }
 0x134   :  { %v86_v20 = vpop.eup %85 }
 0x135   :  { %v43_v22 = vmul.f32 %v86_v20, %v27_v6 }
 0x137   :  { %v52_v24 = vmul.f32 %v79_v21, %v43_v22 }
 0x138   :  { %v88_v25 = vpop.eup %87 }
 0x139   :  { %v61_v26 = vadd.f32 %v80_v23, %v52_v24  ;;  %v44_v27 = vmul.f32 %v88_v25, %v28_v10 }
 0x13b   :  { %v83_v28 = vpack.c.bf16 %v61_v26, %v61_v26  ;;  %v53_v29 = vmul.f32 %v79_v21, %v44_v27 }
 0x13d   :  { %72 = vst.msk [vmem:[%s130_s3] sm:$0xf] %vm71_vm2, %v83_v28  ;;  %v62_v30 = vadd.f32 %v80_v23, %v53_v29 }
 0x13f   :  { %v84_v31 = vpack.c.bf16 %v62_v30, %v62_v30 }
 0x141   :  { %74 = vst.msk [vmem:[%s130_s3 + $0x4] sm:$0x1] %vm73_vm3, %v84_v31 }

// kernel: vit_clip_forward.23
= control target key start
LH: loop header
LB: loop body
LE: loop exit
PB: predicated region body
PF: predicated region fallthrough
CT: control target
= control target key end

     0   :  { %vm16_vm0 = vcmask 261120   ;;  %v209_v0 = vmov 0   ;;  %v210_v2 = vmov 0.0   ;;  %vm122_vm1 = vcmask 523264   ;;  %s271_s1 = inlined_call_operand.vmem [shape: bf16[192,32], index: 1, kind: input, shape index: {}]   ;;  %s272_s0 = inlined_call_operand.vmem [shape: bf16[8,192], index: 0, kind: input, shape index: {}]   ;;  %s273_s2 = inlined_call_operand.vmem [shape: f32[8,32], index: 2, kind: output, shape index: {}]  }
   0x1   :  { %126 = vmatprep.subr.bf16.mxu0 %v209_v0  ;;  %v195_v1 = vld [vmem:[%s271_s1] sm:$0xff]   ;;  %17 = vst.msk [vmem:[#allocation2] sm:$0xff] %vm16_vm0, %v210_v2  ;;  %v196_v3 = vld [vmem:[%s271_s1 + $0x8] sm:$0xff]   ;;  %v197_v4 = vld [vmem:[%s271_s1 + $0x10] sm:$0xff]  }
   0x2   :  { %127 = vmatpush1.bf16.msra.mxu0 %v195_v1  ;;  %v198_v5 = vld [vmem:[%s271_s1 + $0x18] sm:$0xff]   ;;  %v19_v6 = vld [vmem:[%s272_s0] sm:$0xff]  ;;  %v200_v9 = vld [vmem:[%s271_s1 + $0x28] sm:$0xff]  }
   0x3   :  { %128 = vmatprep.subr.bf16.mxu0 %v209_v0  ;;  %v179_v7 = vcombine.high %v19_v6, %v19_v6  ;;  %v199_v8 = vld [vmem:[%s271_s1 + $0x20] sm:$0xff]   ;;  %v201_v10 = vld [vmem:[%s271_s1 + $0x30] sm:$0xff]   ;;  %v202_v11 = vld [vmem:[%s271_s1 + $0x38] sm:$0xff]   ;;  %v178_v16 = vcombine.low %v19_v6, %v19_v6 }
   0x4   :  { %v203_v12 = vld [vmem:[%s271_s1 + $0x40] sm:$0xff]   ;;  %v204_v13 = vld [vmem:[%s271_s1 + $0x48] sm:$0xff]   ;;  %v205_v14 = vld [vmem:[%s271_s1 + $0x50] sm:$0xff]  }
   0x5   :  { %192 = vmatprep.mubr.msk.bf16.mxu0 %vm122_vm1, %v179_v7  ;;  %v206_v15 = vld [vmem:[%s271_s1 + $0x58] sm:$0xff]  }
   0x6   :  { %129 = vmatpush1.bf16.msra.mxu0 %v196_v3 }
   0x7   :  { %130 = vmatprep.subr.bf16.mxu0 %v209_v0 }
   0x8   :  { %v18_v17 = vld [vmem:[#allocation2] sm:$0xff] }
   0xa   :  { %131 = vmatpush1.bf16.msra.mxu0 %v197_v4 }
   0xb   :  { %132 = vmatprep.subr.bf16.mxu0 %v209_v0 }
   0xe   :  { %133 = vmatpush1.bf16.msra.mxu0 %v198_v5 }
   0xf   :  { %134 = vmatprep.subr.bf16.mxu0 %v209_v0 }
  0x12   :  { %135 = vmatpush1.bf16.msra.mxu0 %v199_v8 }
  0x13   :  { %136 = vmatprep.subr.bf16.mxu0 %v209_v0 }
  0x16   :  { %137 = vmatpush1.bf16.msra.mxu0 %v200_v9 }
  0x17   :  { %138 = vmatprep.subr.bf16.mxu0 %v209_v0 }
  0x1a   :  { %139 = vmatpush1.bf16.msra.mxu0 %v201_v10 }
  0x1b   :  { %140 = vmatprep.subr.bf16.mxu0 %v209_v0 }
  0x1e   :  { %141 = vmatpush1.bf16.msra.mxu0 %v202_v11 }
  0x1f   :  { %142 = vmatprep.subr.bf16.mxu0 %v209_v0 }
  0x22   :  { %143 = vmatpush1.bf16.msra.mxu0 %v203_v12 }
  0x23   :  { %144 = vmatprep.subr.bf16.mxu0 %v209_v0 }
  0x26   :  { %145 = vmatpush1.bf16.msra.mxu0 %v204_v13 }
  0x27   :  { %146 = vmatprep.subr.bf16.mxu0 %v209_v0 }
  0x2a   :  { %147 = vmatpush1.bf16.msra.mxu0 %v205_v14 }
  0x2b   :  { %148 = vmatprep.subr.bf16.mxu0 %v209_v0 }
  0x2e   :  { %149 = vmatpush1.bf16.msra.mxu0 %v206_v15 }
  0x31   :  { %159 = vmatmul.mubr.bf16.vlgmr.msra.gmra.mrb[0].mxu0 %v178_v16 }
 0x104   :  { %v160_v18 = vpop.f32.mrb[0].mxu0 }
 0x105   :  { %v166_v19 = vadd.f32 %v160_v18, %v18_v17  ;;  %v162_v20 = vpop.f32.mrb[1].mxu0 }
 0x106   :  { %v163_v21 = vpop.f32.mrb[2].mxu0 }
 0x107   :  { %168 = vst.msk [vmem:[#allocation2] sm:$0xff] %vm16_vm0, %v166_v19  ;;  %v164_v22 = vpop.f32.mrb[3].mxu0 }
 0x10e   :  { %v172_v23 = vld [vmem:[#allocation2] sm:$0xff] }
 0x10f   :  { %173 = vst.msk [vmem:[%s273_s2] sm:$0xff] %vm16_vm0, %v172_v23 }

// kernel: vit_clip_forward.32
= control target key start
LH: loop header
LB: loop body
LE: loop exit
PB: predicated region body
PF: predicated region fallthrough
CT: control target
= control target key end

     0   :  { %v174_v0 = vmov 0.0   ;;  %vm175_vm0 = vmmov 0   ;;  %vm46_vm1 = vcmask 261120   ;;  %s214_s1 = inlined_call_operand.vmem [shape: bf16[32,128], index: 1, kind: input, shape index: {}]   ;;  %s215_s0 = inlined_call_operand.vmem [shape: bf16[10,32], index: 0, kind: input, shape index: {}]   ;;  %s216_s2 = inlined_call_operand.vmem [shape: f32[1,128], index: 2, kind: input, shape index: {}]   ;;  %s217_s3 = inlined_call_operand.vmem [shape: bf16[10,128], index: 3, kind: output, shape index: {}]  }
   0x1   :  { %153 = vmatprep.subr.bf16.mxu0 %v174_v0  ;;  %20 = vst [vmem:[#allocation2 + $0x8] sm:$0x3] %v174_v0  ;;  %v163_v1 = vld [vmem:[%s214_s1] sm:$0xff]   ;;  %157 = vmatprep.mubr.msk.bf16.mxu0 %vm175_vm0, %v174_v0  ;;  %v164_v2 = vld [vmem:[%s214_s1 + $0x8] sm:$0xff]  }
   0x2   :  { %154 = vmatpush3.bf16.msra.mxu0 %v163_v1  ;;  %v165_v3 = vld [vmem:[%s215_s0] sm:$0x1f]  }
   0x3   :  { %155 = vmatprep.subr.bf16.mxu0 %v174_v0  ;;  %v143_v5 = vld [vmem:[%s216_s2] ss:$0 sm:$0xff] }
   0x6   :  { %156 = vmatpush3.bf16.msra.mxu0 %v164_v2 }
   0x8   :  { %v22_v6 = vld [vmem:[#allocation2 + $0x8] sm:$0x3] }
   0x9   :  { %158 = vmatmul.mubr.msk.bf16.vlgmr.msra.gmra.mrb[0].mxu0 %vm46_vm1, %v165_v3 }
  0xdc   :  { %v84_v4 = vpop.f32.mrb[0].mxu0 }
  0xdd   :  { %v159_v7 = vpop.f32.mrb[1].mxu0  ;;  %v107_v9 = vadd.f32 %v143_v5, %v84_v4 }
  0xde   :  { %v87_v8 = vpop.f32.mrb[2].mxu0 }
  0xdf   :  { %v92_v10 = vadd.f32 %v87_v8, %v22_v6  ;;  %v160_v11 = vpop.f32.mrb[3].mxu0  ;;  %v144_v12 = vmul.f32 -1.702, %v107_v9 }
  0xe1   :  { %94 = vst [vmem:[#allocation2 + $0x8] sm:$0x3] %v92_v10  ;;  %v113_v13 = vmul.f32 1.442695, %v144_v12 }
  0xe3   :  { %166 = vpow2.f32 %v113_v13 }
  0xe8   :  { %v99_v14 = vld [vmem:[#allocation2 + $0x8] sm:$0x3] }
  0xe9   :  { %v108_v15 = vadd.f32 %v143_v5, %v99_v14 }
  0xeb   :  { %v145_v16 = vmul.f32 -1.702, %v108_v15 }
  0xed   :  { %v115_v17 = vmul.f32 1.442695, %v145_v16  ;;  %v167_v18 = vpop.eup %166 }
  0xee   :  { %v117_v19 = vadd.f32 1.0, %v167_v18 }
  0xef   :  { %168 = vpow2.f32 %v115_v17 }
  0xf0   :  { %170 = vrcp.f32 %v117_v19 }
  0xf9   :  { %v169_v20 = vpop.eup %168 }
  0xfa   :  { %v118_v21 = vadd.f32 1.0, %v169_v20  ;;  %v171_v22 = vpop.eup %170 }
  0xfb   :  { %v123_v23 = vmul.f32 %v171_v22, %v107_v9 }
  0xfc   :  { %172 = vrcp.f32 %v118_v21 }
  0xfd   :  { %v148_v24 = vpack.c.bf16 %v123_v23, %v123_v23 }
  0xff   :  { %133 = vst [vmem:[%s217_s3] sm:$0xf] %v148_v24 }
 0x106   :  { %v173_v25 = vpop.eup %172 }
 0x107   :  { %v124_v26 = vmul.f32 %v173_v25, %v108_v15 }
 0x109   :  { %v149_v27 = vpack.c.bf16 %v124_v26, %v124_v26 }
 0x10b   :  { %134 = vst [vmem:[%s217_s3 + $0x4] sm:$0x1] %v149_v27 }

// kernel: vit_clip_forward.30
= control target key start
LH: loop header
LB: loop body
LE: loop exit
PB: predicated region body
PF: predicated region fallthrough
CT: control target
= control target key end

     0   :  { %vm22_vm0 = vcmask 261120   ;;  %v146_v0 = vmov 0.0   ;;  %vm147_vm1 = vmmov 0   ;;  %vm24_vm2 = vcmask 254976   ;;  %s204_s1 = inlined_call_operand.vmem [shape: bf16[32,32], index: 1, kind: input, shape index: {}]   ;;  %s205_s0 = inlined_call_operand.vmem [shape: bf16[10,32], index: 0, kind: input, shape index: {}]   ;;  %s206_s2 = inlined_call_operand.vmem [shape: f32[1,32], index: 2, kind: input, shape index: {}]   ;;  %s207_s3 = inlined_call_operand.vmem [shape: f32[10,32], index: 3, kind: input, shape index: {}]   ;;  %s208_s4 = inlined_call_operand.vmem [shape: f32[10,32], index: 4, kind: output, shape index: {}]  }
   0x1   :  { %133 = vmatprep.subr.bf16.mxu0 %v146_v0  ;;  %v143_v1 = vld [vmem:[%s204_s1] sm:$0xff]   ;;  %137 = vmatprep.mubr.msk.bf16.mxu0 %vm147_vm1, %v146_v0  ;;  %23 = vst.msk [vmem:[#allocation2] sm:$0xff] %vm22_vm0, %v146_v0  ;;  %v144_v2 = vld [vmem:[%s204_s1 + $0x8] sm:$0xff]  }
   0x2   :  { %134 = vmatpush3.bf16.msra.mxu0 %v143_v1  ;;  %v145_v3 = vld [vmem:[%s205_s0] sm:$0x1f]   ;;  %25 = vst.msk [vmem:[#allocation2 + $0x8] sm:$0x3] %vm24_vm2, %v146_v0  ;;  %v116_v17 = vld [vmem:[%s207_s3 + $0x8] sm:$0x3] }
   0x3   :  { %135 = vmatprep.subr.bf16.mxu0 %v146_v0  ;;  %v129_v12 = vld [vmem:[%s206_s2] ss:$0 sm:$0xff] }
   0x4   :  { %v115_v14 = vld [vmem:[%s207_s3] sm:$0xff] }
   0x6   :  { %136 = vmatpush3.bf16.msra.mxu0 %v144_v2 }
   0x8   :  { %v26_v4 = vld [vmem:[#allocation2] sm:$0xff] }
   0x9   :  { %138 = vmatmul.mubr.msk.bf16.vlgmr.msra.gmra.mrb[0].mxu0 %vm22_vm0, %v145_v3  ;;  %v27_v6 = vld [vmem:[#allocation2 + $0x8] sm:$0x3] }
  0xdc   :  { %v89_v5 = vpop.f32.mrb[0].mxu0 }
  0xdd   :  { %v96_v7 = vadd.f32 %v89_v5, %v26_v4  ;;  %v139_v8 = vpop.f32.mrb[1].mxu0 }
  0xde   :  { %v92_v9 = vpop.f32.mrb[2].mxu0 }
  0xdf   :  { %98 = vst.msk [vmem:[#allocation2] sm:$0xff] %vm22_vm0, %v96_v7  ;;  %v97_v10 = vadd.f32 %v92_v9, %v27_v6  ;;  %v140_v11 = vpop.f32.mrb[3].mxu0 }
  0xe1   :  { %100 = vst.msk [vmem:[#allocation2 + $0x8] sm:$0x3] %vm24_vm2, %v97_v10 }
  0xe6   :  { %v104_v13 = vld [vmem:[#allocation2] sm:$0xff] }
  0xe7   :  { %v113_v15 = vadd.f32 %v129_v12, %v104_v13 }
  0xe8   :  { %v105_v16 = vld [vmem:[#allocation2 + $0x8] sm:$0x3] }
  0xe9   :  { %v114_v18 = vadd.f32 %v129_v12, %v105_v16  ;;  %v117_v19 = vadd.f32 %v115_v14, %v113_v15 }
  0xeb   :  { %v118_v20 = vadd.f32 %v116_v17, %v114_v18  ;;  %119 = vst.msk [vmem:[%s208_s4] sm:$0xff] %vm22_vm0, %v117_v19 }
  0xed   :  { %120 = vst.msk [vmem:[%s208_s4 + $0x8] sm:$0x3] %vm24_vm2, %v118_v20 }

// kernel: vit_clip_forward.29
= control target key start
LH: loop header
LB: loop body
LE: loop exit
PB: predicated region body
PF: predicated region fallthrough
CT: control target
= control target key end

     0   :  { %s982_s12 = smov 0   ;;  %s1098_s0 = inlined_call_operand.vmem [shape: bf16[2,5,32], index: 0, kind: input, shape index: {}]   ;;  %s1099_s1 = inlined_call_operand.vmem [shape: bf16[2,5,32], index: 1, kind: input, shape index: {}]   ;;  %s1100_s2 = inlined_call_operand.vmem [shape: bf16[2,5,32], index: 2, kind: input, shape index: {}]   ;;  %s1101_s3 = inlined_call_operand.vmem [shape: bf16[2,5,32], index: 3, kind: output, shape index: {}]  }
   0x1 LB: > { %s805_s13 = sadd.s32 4294967295, %s951_s12   ;;  %p809_p0 = scmp.ge.s32.totalorder %s951_s12, 1  ;;  %s951_s12 = sphi %s982_s12, %s13_s12  }
   0x2   : > { %p154_p1 = scmp.lt.s32.totalorder %s951_s12, 3 }
   0x4   : > { %p155_p2 = pnand %p809_p0, %p154_p1 }
   0x5   : > { %p184_p3 = scmp.lt.s32.totalorder (!%p155_p2), %s805_s13, 1  ;;  %v953_v0 = vmov (!%p155_p2), 0.0   ;;  %vm954_vm0 = vmmov (!%p155_p2), 0   ;;  %vm204_vm1 = vcmask (!%p155_p2), 64512   ;;  %s955_s21 = smov (!%p155_p2), 120   ;;  %vm252_vm2 = vcmask (!%p155_p2), 36864  }
   0x6   : > { %158 = sbr.rel (%p155_p2) target bundleno = 1167 (0x48f), region = 32  ;;  %855 = vmatprep.subr.bf16.mxu0 (!%p155_p2), %v953_v0  ;;  %857 = vmatprep.mubr.msk.bf16.mxu0 (!%p155_p2), %vm954_vm0, %v953_v0  ;;  %s956_s22 = smov (!%p155_p2), 112   ;;  %vm267_vm3 = vcmask (!%p155_p2), 1041408   ;;  %vm268_vm4 = vcmask (!%p155_p2), 1042432   ;;  %v958_v17 = vmov (!%p155_p2), 65535   ;;  %vm263_vm5 = vcmask (!%p155_p2), 39936  }
   0x7   : > { %861 = vmatprep.subr.bf16.mxu1 (!%p155_p2), %v953_v0  ;;  %863 = vmatprep.mubr.msk.bf16.mxu1 (!%p155_p2), %vm954_vm0, %v953_v0  ;;  %s957_s23 = smov (!%p155_p2), 104   ;;  %v269_v18 = vsel (!%p155_p2), %vm267_vm3, 4294967295, %v958_v17  ;;  %vm317_vm6 = vcmask (!%p155_p2), 59392   ;;  %vm318_vm7 = vsmask.f32 (!%p155_p2), 2304  ;;  %s959_s30 = smov (!%p155_p2), 8  }
   0x8   : > { %v1024_v19 = vsel (!%p155_p2), %vm268_vm4, %v269_v18, 0  ;;  %vm319_vm8 = vmand (!%p155_p2), %vm317_vm6, %vm318_vm7  ;;  %s960_s4 = smov (!%p155_p2), 16   ;;  %s961_s5 = smov (!%p155_p2), 24   ;;  %vm453_vm9 = vcmask (!%p155_p2), 124992   ;;  %vm588_vm11 = vcmask (!%p155_p2), 190592   ;;  %vm723_vm13 = vcmask (!%p155_p2), 256192  }
   0x9   : > { %vm454_vm10 = vmand (!%p155_p2), %vm453_vm9, %vm318_vm7 }
   0xa   : > { %vm589_vm12 = vmand (!%p155_p2), %vm588_vm11, %vm318_vm7 }
   0xb   : > { %vm724_vm14 = vmand (!%p155_p2), %vm723_vm13, %vm318_vm7 }
   0xd   : > { %s1103_s13 = smov (!%p184_p3, %s805_s13), 1 }
   0xe   : > { %s996_s14 = sshll.u32 %s1103_s13, 2 }
   0xf   : > { %s191_s17 = scalar_lea.vmem %s1099_s1, %s996_s14  ;;  %s187_s20 = scalar_lea.vmem %s1098_s0, %s996_s14 }
  0x10   : > { %v202_v1 = vld [vmem:[%s191_s17] sm:$0x7]  ;;  %s1021_s26 = scalar_lea.vmem %s1100_s2, %s996_s14  ;;  %s1080_s29 = scalar_lea.vmem %s1101_s3, %s996_s14 }
  0x11   : > { %v209_v2 = vsel %vm204_vm1, %v202_v1, 0  ;;  %v201_v3 = vld [vmem:[%s187_s20] sm:$0x7] }
  0x12   : > { %856 = vmatpush3.bf16.xpose.msra.mxu0 %v209_v2  ;;  %v921_v4 = vld [vmem:[%s187_s20] ss:$0 sps:$4 sm:$0x77]  }
  0x13   : > { %873 = vmatprep.subr.bf16.mxu0 %v953_v0  ;;  %329 = vrot.lane.b32.xlu1 %v921_v4, %s955_s21  ;;  %v922_v5 = vld [vmem:[%s191_s17] ss:$0 sps:$4 sm:$0x77]  }
  0x14   : > { %v923_v6 = vld [vmem:[%s187_s20] ss:$0 sps:$4 sm:$0x77]  }
  0x15   : > { %v924_v7 = vld [vmem:[%s191_s17] ss:$0 sps:$4 sm:$0x77]  }
  0x16   : > { %v925_v8 = vld [vmem:[%s187_s20] ss:$0 sps:$4 sm:$0x77]  }
  0x17   : > { %469 = vrot.lane.b32.xlu1 %v922_v5, %s956_s22  ;;  %v920_v15 = vld [vmem:[%s191_s17] ss:$0 sps:$4 sm:$0x77]  }
  0x18   : > { %v203_v16 = vld [vmem:[%s1021_s26] sm:$0x7] }
  0x19   : > { %858 = vmatmul.mubr.msk.bf16.vlgmr.msra.gmra.mrb[0].mxu0 %vm204_vm1, %v201_v3  ;;  %v272_v20 = vand.u32 %v1024_v19, %v203_v16  ;;  %v926_v52 = vld [vmem:[%s1021_s26] ss:$0 sps:$4 sm:$0x77]  }
  0x1a   : > { %875 = vmatprep.mubr.msk.bf16.mxu0 %vm954_vm0, %v953_v0  ;;  %v927_v56 = vld [vmem:[%s1021_s26] ss:$0 sps:$4 sm:$0x77]  }
  0x1b   : > { %464 = vrot.lane.b32.xlu1 %v923_v6, %s956_s22  ;;  %862 = vmatpush3.bf16.msra.mxu1 %v272_v20  ;;  %v928_v59 = vld [vmem:[%s1021_s26] ss:$0 sps:$4 sm:$0x77]  }
  0x1c   : > { %867 = vmatprep.subr.bf16.mxu1 %v953_v0 }
  0x1f   : > { %604 = vrot.lane.b32.xlu1 %v924_v7, %s957_s23 }
  0x23   : > { %599 = vrot.lane.b32.xlu1 %v925_v8, %s957_s23 }
  0x85   : > { %v330_v26 = vpop.permute.xlu1 %329 }
  0x89   : > { %v470_v29 = vpop.permute.xlu1 %469 }
  0x8a   : > { %v475_v30 = vsel %vm204_vm1, %v470_v29, 0 }
  0x8d   : > { %v465_v31 = vpop.permute.xlu1 %464 }
  0x91   : > { %v605_v32 = vpop.permute.xlu1 %604 }
  0x92   : > { %v610_v33 = vsel %vm204_vm1, %v605_v32, 0 }
  0x95   : > { %v600_v34 = vpop.permute.xlu1 %599 }
  0xec   : > { %v245_v9 = vpop.f32.mrb[0].mxu0 }
  0xed   : > { %v251_v10 = vmul.f32 0.35355338, %v245_v9  ;;  %v859_v11 = vpop.f32.mrb[1].mxu0 }
  0xee   : > { %v248_v12 = vpop.f32.mrb[2].mxu0 }
  0xef   : > { %v860_v13 = vpop.f32.mrb[3].mxu0  ;;  %v253_v14 = vsel %vm252_vm2, %v251_v10, -inf }
  0xf0   : > { %254 = vmax.xlane.f32.xlu0 %v253_v14 }
 0x106   : > { %334 = vrot.lane.b32.xlu0 %v920_v15, %s955_s21 }
 0x17d   : > { %v255_v21 = vpop.xlane.xlu0 %254 }
 0x17e   : > { %v256_v22 = vsub.f32 %v251_v10, %v255_v21 }
 0x180   : > { %v257_v23 = vmul.f32 1.442695, %v256_v22 }
 0x181   : > { %v335_v24 = vpop.permute.xlu0 %334 }
 0x182   : > { %929 = vpow2.f32 %v257_v23  ;;  %v340_v27 = vsel %vm204_vm1, %v335_v24, 0 }
 0x18c   : > { %v1029_v25 = vpop.eup %929 }
 0x18d   : > { %v262_v28 = vpack.c.bf16 %v1029_v25, %v1029_v25  ;;  %v259_v22 = vsel %vm252_vm2, %v1029_v25, 0.0 }
 0x18f   : > { %864 = vmatmul.mubr.msk.bf16.vlgmr.msra.gmra.mrb[0].mxu1 %vm263_vm5, %v262_v28 }
 0x190   : > { %868 = vmatpush3.bf16.xpose.msra.mxu1 %v340_v27  ;;  %869 = vmatprep.mubr.msk.bf16.mxu1 %vm954_vm0, %v953_v0  ;;  %v320_v27 = vld [vmem:[%s1080_s29] sm:$0x7] }
 0x191   : > { %879 = vmatprep.subr.bf16.mxu1 %v953_v0 }
 0x197   : > { %870 = vmatmul.mubr.msk.bf16.vlgmr.msra.gmra.mrb[4].mxu1 %vm204_vm1, %v330_v26 }
 0x198   : > { %880 = vmatpush3.bf16.xpose.msra.mxu1 %v475_v30  ;;  %881 = vmatprep.mubr.msk.bf16.mxu1 %vm954_vm0, %v953_v0 }
 0x199   : > { %891 = vmatprep.subr.bf16.mxu1 %v953_v0 }
 0x19f   : > { %882 = vmatmul.mubr.msk.bf16.vlgmr.msra.gmra.mrb[8].mxu1 %vm204_vm1, %v465_v31 }
 0x1a0   : > { %892 = vmatpush3.bf16.xpose.msra.mxu1 %v610_v33  ;;  %893 = vmatprep.mubr.msk.bf16.mxu1 %vm954_vm0, %v953_v0 }
 0x1a7   : > { %894 = vmatmul.mubr.msk.bf16.vlgmr.msra.gmra.mrb[12].mxu1 %vm204_vm1, %v600_v34 }
 0x262   : > { %v1048_v35 = vpop.f32.mrb[0].mxu1 }
 0x263   : > { %v865_v36 = vpop.f32.mrb[1].mxu1 }
 0x264   : > { %v311_v37 = vpop.f32.mrb[2].mxu1 }
 0x265   : > { %v866_v38 = vpop.f32.mrb[3].mxu1 }
 0x26a   : > { %v376_v39 = vpop.f32.mrb[4].mxu1 }
 0x26b   : > { %v382_v40 = vmul.f32 0.35355338, %v376_v39  ;;  %v871_v41 = vpop.f32.mrb[5].mxu1 }
 0x26c   : > { %v379_v42 = vpop.f32.mrb[6].mxu1 }
 0x26d   : > { %v872_v43 = vpop.f32.mrb[7].mxu1  ;;  %v383_v44 = vsel %vm252_vm2, %v382_v40, -inf }
 0x26e   : > { %384 = vmax.xlane.f32.xlu1 %v383_v44 }
 0x272   : > { %v511_v45 = vpop.f32.mrb[8].mxu1 }
 0x273   : > { %v517_v46 = vmul.f32 0.35355338, %v511_v45  ;;  %v883_v47 = vpop.f32.mrb[9].mxu1 }
 0x274   : > { %v514_v48 = vpop.f32.mrb[10].mxu1 }
 0x275   : > { %v518_v49 = vsel %vm252_vm2, %v517_v46, -inf  ;;  %v884_v50 = vpop.f32.mrb[11].mxu1 }
 0x276   : > { %519 = vmax.xlane.f32.xlu0 %v518_v49 }
 0x27a   : > { %v646_v51 = vpop.f32.mrb[12].mxu1 }
 0x27b   : > { %v895_v53 = vpop.f32.mrb[13].mxu1  ;;  %v652_v57 = vmul.f32 0.35355338, %v646_v51 }
 0x27c   : > { %v649_v54 = vpop.f32.mrb[14].mxu1 }
 0x27d   : > { %v896_v55 = vpop.f32.mrb[15].mxu1  ;;  %v653_v58 = vsel %vm252_vm2, %v652_v57, -inf }
 0x27f   : > { %531 = vrot.lane.b32.xlu1 %v926_v52, %s956_s22 }
 0x28c   : > { %396 = vrot.lane.b32.xlu0 %v927_v56, %s955_s21 }
 0x2a3   : > { %654 = vmax.xlane.f32.xlu1 %v653_v58 }
 0x2b4   : > { %666 = vrot.lane.b32.xlu1 %v928_v59, %s957_s23 }
 0x2fb   : > { %v385_v60 = vpop.xlane.xlu1 %384 }
 0x2fc   : > { %v386_v61 = vsub.f32 %v382_v40, %v385_v60 }
 0x2fe   : > { %v387_v62 = vmul.f32 1.442695, %v386_v61 }
 0x2ff   : > { %v532_v5 = vpop.permute.xlu1 %531 }
 0x300   : > { %931 = vpow2.f32 %v387_v62  ;;  %v537_v9 = vand.u32 %v532_v5, %v1024_v19 }
 0x303   : > { %v520_v63 = vpop.xlane.xlu0 %519 }
 0x304   : > { %v521_v1 = vsub.f32 %v517_v46, %v520_v63 }
 0x306   : > { %v522_v2 = vmul.f32 1.442695, %v521_v1 }
 0x307   : > { %v397_v3 = vpop.permute.xlu0 %396 }
 0x308   : > { %933 = vpow2.f32 %v522_v2  ;;  %v402_v4 = vand.u32 %v397_v3, %v1024_v19 }
 0x30a   : > { %v932_v6 = vpop.eup %931  ;;  %874 = vmatpush3.bf16.msra.mxu0 %v402_v4 }
 0x30b   : > { %v389_v7 = vsel %vm252_vm2, %v932_v6, 0.0  ;;  %v392_v8 = vpack.c.bf16 %v932_v6, %v932_v6  ;;  %885 = vmatprep.subr.bf16.mxu0 %v953_v0 }
 0x30c   : > { %390 = vadd.xlane.f32.xlu0 %v389_v7 }
 0x30d   : > { %876 = vmatmul.mubr.msk.bf16.vlgmr.msra.gmra.mrb[4].mxu0 %vm263_vm5, %v392_v8 }
 0x30e   : > { %886 = vmatpush3.bf16.msra.mxu0 %v537_v9  ;;  %887 = vmatprep.mubr.msk.bf16.mxu0 %vm954_vm0, %v953_v0 }
 0x30f   : > { %897 = vmatprep.subr.bf16.mxu0 %v953_v0 }
 0x312   : > { %v934_v10 = vpop.eup %933 }
 0x313   : > { %v524_v11 = vsel %vm252_vm2, %v934_v10, 0.0  ;;  %v527_v12 = vpack.c.bf16 %v934_v10, %v934_v10 }
 0x314   : > { %525 = vadd.xlane.f32.xlu1 %v524_v11 }
 0x315   : > { %888 = vmatmul.mubr.msk.bf16.vlgmr.msra.gmra.mrb[8].mxu0 %vm263_vm5, %v527_v12 }
 0x316   : > { %899 = vmatprep.mubr.msk.bf16.mxu0 %vm954_vm0, %v953_v0 }
 0x330   : > { %v655_v13 = vpop.xlane.xlu1 %654 }
 0x331   : > { %v656_v14 = vsub.f32 %v652_v57, %v655_v13 }
 0x333   : > { %v657_v15 = vmul.f32 1.442695, %v656_v14 }
 0x334   : > { %v667_v16 = vpop.permute.xlu1 %666 }
 0x335   : > { %935 = vpow2.f32 %v657_v15  ;;  %v672_v17 = vand.u32 %v667_v16, %v1024_v19 }
 0x337   : > { %898 = vmatpush3.bf16.msra.mxu0 %v672_v17 }
 0x33f   : > { %v936_v18 = vpop.eup %935 }
 0x340   : > { %v659_v20 = vsel %vm252_vm2, %v936_v18, 0.0  ;;  %v662_v21 = vpack.c.bf16 %v936_v18, %v936_v18 }
 0x341   : > { %660 = vadd.xlane.f32.xlu0 %v659_v20 }
 0x342   : > { %900 = vmatmul.mubr.msk.bf16.vlgmr.msra.gmra.mrb[12].mxu0 %vm263_vm5, %v662_v21 }
 0x345   : > { %260 = vadd.xlane.f32.xlu0 %v259_v22 }
 0x399   : > { %v391_v0 = vpop.xlane.xlu0 %390 }
 0x3a1   : > { %v526_v26 = vpop.xlane.xlu1 %525 }
 0x3ce   : > { %v661_v23 = vpop.xlane.xlu0 %660 }
 0x3d2   : > { %v261_v24 = vpop.xlane.xlu0 %260 }
 0x3d3   : > { %937 = vrcp.f32 %v261_v24 }
 0x3d4   : > { %939 = vrcp.f32 %v391_v0 }
 0x3d5   : > { %941 = vrcp.f32 %v526_v26 }
 0x3d6   : > { %943 = vrcp.f32 %v661_v23 }
 0x3dd   : > { %v938_v19 = vpop.eup %937 }
 0x3de   : > { %v315_v25 = vmul.f32 %v938_v19, %v1048_v35  ;;  %v940_v28 = vpop.eup %939 }
 0x3df   : > { %v942_v38 = vpop.eup %941 }
 0x3e0   : > { %v316_v29 = vpack.c.bf16 %v315_v25, %v315_v25  ;;  %v438_v30 = vpop.f32.mrb[4].mxu0  ;;  %v944_v44 = vpop.eup %943 }
 0x3e1   : > { %v445_v31 = vmul.f32 %v940_v28, %v438_v30  ;;  %v877_v32 = vpop.f32.mrb[5].mxu0 }
 0x3e2   : > { %v441_v33 = vpop.f32.mrb[6].mxu0  ;;  %v321_v34 = vsel %vm319_vm8, %v316_v29, %v320_v27 }
 0x3e3   : > { %v836_v36 = vpack.c.bf16 %v445_v31, %v445_v31  ;;  %v878_v37 = vpop.f32.mrb[7].mxu0  ;;  %322 = vst [vmem:[%s1080_s29] sm:$0x7] %v321_v34 }
 0x3e5   : > { %450 = vrot.lane.b32.xlu1 %v836_v36, %s959_s30 }
 0x3e8   : > { %v573_v39 = vpop.f32.mrb[8].mxu0 }
 0x3e9   : > { %v580_v40 = vmul.f32 %v942_v38, %v573_v39  ;;  %v889_v41 = vpop.f32.mrb[9].mxu0 }
 0x3ea   : > { %v576_v35 = vpop.f32.mrb[10].mxu0  ;;  %v455_v51 = vld [vmem:[%s1080_s29] sm:$0x7] }
 0x3eb   : > { %v837_v42 = vpack.c.bf16 %v580_v40, %v580_v40  ;;  %v890_v43 = vpop.f32.mrb[11].mxu0 }
 0x3ed   : > { %585 = vrot.lane.b32.xlu0 %v837_v42, %s960_s4 }
 0x415   : > { %v708_v45 = vpop.f32.mrb[12].mxu0 }
 0x416   : > { %v715_v46 = vmul.f32 %v944_v44, %v708_v45  ;;  %v901_v47 = vpop.f32.mrb[13].mxu0 }
 0x417   : > { %v711_v48 = vpop.f32.mrb[14].mxu0 }
 0x418   : > { %v838_v49 = vpack.c.bf16 %v715_v46, %v715_v46  ;;  %v902_v50 = vpop.f32.mrb[15].mxu0 }
 0x41a   : > { %720 = vrot.lane.b32.xlu1 %v838_v49, %s961_s5 }
 0x457   : > { %v451_v52 = vpop.permute.xlu1 %450 }
 0x458   : > { %v456_v53 = vsel %vm454_vm10, %v451_v52, %v455_v51 }
 0x459   : > { %457 = vst [vmem:[%s1080_s29] sm:$0x7] %v456_v53 }
 0x45f   : > { %v586_v54 = vpop.permute.xlu0 %585 }
 0x460   : > { %v590_v55 = vld [vmem:[%s1080_s29] sm:$0x7] }
 0x461   : > { %v591_v56 = vsel %vm589_vm12, %v586_v54, %v590_v55 }
 0x462   : > { %592 = vst [vmem:[%s1080_s29] sm:$0x7] %v591_v56 }
 0x469   : > { %v725_v57 = vld [vmem:[%s1080_s29] sm:$0x7] }
 0x48c   : > { %v721_v58 = vpop.permute.xlu1 %720 }
 0x48d   : > { %v726_v59 = vsel %vm724_vm14, %v721_v58, %v725_v57 }
 0x48e   : > { %727 = vst [vmem:[%s1080_s29] sm:$0x7] %v726_v59 }
 0x48f PF: > { %s13_s12 = sadd.s32 1, %s951_s12  }
 0x490   : > { %p10_p4 = scmp.ge.s32.totalorder %s13_s12, 4  }
 0x492   :  { %12 = sbr.rel (!%p10_p4) target bundleno = 1 (0x1), region = 68 }

// kernel: vit_clip_forward.33
= control target key start
LH: loop header
LB: loop body
LE: loop exit
PB: predicated region body
PF: predicated region fallthrough
CT: control target
= control target key end

     0   :  { %vm22_vm0 = vcmask 261120   ;;  %v221_v0 = vmov 0.0   ;;  %vm222_vm1 = vmmov 0   ;;  %vm24_vm2 = vcmask 254976   ;;  %s296_s1 = inlined_call_operand.vmem [shape: bf16[128,32], index: 1, kind: input, shape index: {}]   ;;  %s297_s0 = inlined_call_operand.vmem [shape: bf16[10,128], index: 0, kind: input, shape index: {}]   ;;  %s298_s2 = inlined_call_operand.vmem [shape: f32[1,32], index: 2, kind: input, shape index: {}]   ;;  %s299_s3 = inlined_call_operand.vmem [shape: f32[10,32], index: 3, kind: input, shape index: {}]   ;;  %s300_s4 = inlined_call_operand.vmem [shape: f32[10,32], index: 4, kind: output, shape index: {}]  }
   0x1   :  { %190 = vmatprep.subr.bf16.mxu0 %v221_v0  ;;  %v212_v1 = vld [vmem:[%s296_s1] sm:$0xff]   ;;  %206 = vmatprep.mubr.msk.bf16.mxu0 %vm222_vm1, %v221_v0  ;;  %23 = vst.msk [vmem:[#allocation2] sm:$0xff] %vm22_vm0, %v221_v0  ;;  %v213_v2 = vld [vmem:[%s296_s1 + $0x8] sm:$0xff]   ;;  %v214_v3 = vld [vmem:[%s296_s1 + $0x10] sm:$0xff]  }
   0x2   :  { %191 = vmatpush3.bf16.msra.mxu0 %v212_v1  ;;  %v215_v4 = vld [vmem:[%s296_s1 + $0x18] sm:$0xff]   ;;  %v216_v5 = vld [vmem:[%s296_s1 + $0x20] sm:$0xff]   ;;  %v217_v6 = vld [vmem:[%s296_s1 + $0x28] sm:$0xff]   ;;  %25 = vst.msk [vmem:[#allocation2 + $0x8] sm:$0x3] %vm24_vm2, %v221_v0 }
   0x3   :  { %192 = vmatprep.subr.bf16.mxu0 %v221_v0  ;;  %v218_v7 = vld [vmem:[%s296_s1 + $0x30] sm:$0xff]   ;;  %v219_v8 = vld [vmem:[%s296_s1 + $0x38] sm:$0xff]   ;;  %v220_v9 = vld [vmem:[%s297_s0] sm:$0x1f]  }
   0x4   :  { %v180_v18 = vld [vmem:[%s298_s2] ss:$0 sm:$0xff]  ;;  %v162_v23 = vld [vmem:[%s299_s3 + $0x8] sm:$0x3] }
   0x5   :  { %v161_v20 = vld [vmem:[%s299_s3] sm:$0xff] }
   0x6   :  { %193 = vmatpush3.bf16.msra.mxu0 %v213_v2 }
   0x7   :  { %194 = vmatprep.subr.bf16.mxu0 %v221_v0 }
   0x8   :  { %v26_v10 = vld [vmem:[#allocation2] sm:$0xff] }
   0x9   :  { %v27_v12 = vld [vmem:[#allocation2 + $0x8] sm:$0x3] }
   0xa   :  { %195 = vmatpush3.bf16.msra.mxu0 %v214_v3 }
   0xb   :  { %196 = vmatprep.subr.bf16.mxu0 %v221_v0 }
   0xe   :  { %197 = vmatpush3.bf16.msra.mxu0 %v215_v4 }
   0xf   :  { %198 = vmatprep.subr.bf16.mxu0 %v221_v0 }
  0x12   :  { %199 = vmatpush3.bf16.msra.mxu0 %v216_v5 }
  0x13   :  { %200 = vmatprep.subr.bf16.mxu0 %v221_v0 }
  0x16   :  { %201 = vmatpush3.bf16.msra.mxu0 %v217_v6 }
  0x17   :  { %202 = vmatprep.subr.bf16.mxu0 %v221_v0 }
  0x1a   :  { %203 = vmatpush3.bf16.msra.mxu0 %v218_v7 }
  0x1b   :  { %204 = vmatprep.subr.bf16.mxu0 %v221_v0 }
  0x1e   :  { %205 = vmatpush3.bf16.msra.mxu0 %v219_v8 }
  0x21   :  { %207 = vmatmul.mubr.bf16.vlgmr.msra.gmra.mrb[0].mxu0 %v220_v9 }
  0xf4   :  { %v134_v11 = vpop.f32.mrb[0].mxu0 }
  0xf5   :  { %v141_v13 = vadd.f32 %v134_v11, %v26_v10  ;;  %v208_v14 = vpop.f32.mrb[1].mxu0 }
  0xf6   :  { %v137_v15 = vpop.f32.mrb[2].mxu0 }
  0xf7   :  { %144 = vst.msk [vmem:[#allocation2] sm:$0xff] %vm22_vm0, %v141_v13  ;;  %v142_v16 = vadd.f32 %v137_v15, %v27_v12  ;;  %v209_v17 = vpop.f32.mrb[3].mxu0 }
  0xf9   :  { %146 = vst.msk [vmem:[#allocation2 + $0x8] sm:$0x3] %vm24_vm2, %v142_v16 }
  0xfe   :  { %v150_v19 = vld [vmem:[#allocation2] sm:$0xff] }
  0xff   :  { %v159_v21 = vadd.f32 %v180_v18, %v150_v19 }
 0x100   :  { %v151_v22 = vld [vmem:[#allocation2 + $0x8] sm:$0x3] }
 0x101   :  { %v163_v24 = vadd.f32 %v161_v20, %v159_v21  ;;  %v160_v25 = vadd.f32 %v180_v18, %v151_v22 }
 0x103   :  { %165 = vst.msk [vmem:[%s300_s4] sm:$0xff] %vm22_vm0, %v163_v24  ;;  %v164_v26 = vadd.f32 %v162_v23, %v160_v25 }
 0x105   :  { %166 = vst.msk [vmem:[%s300_s4 + $0x8] sm:$0x3] %vm24_vm2, %v164_v26 }

// kernel: vit_clip_forward.44
= control target key start
LH: loop header
LB: loop body
LE: loop exit
PB: predicated region body
PF: predicated region fallthrough
CT: control target
= control target key end

     0   :  { %vm16_vm0 = vcmask 123904   ;;  %v112_v0 = vmov 0.0   ;;  %vm113_vm1 = vmmov 0   ;;  %vm36_vm2 = vcmask 261120   ;;  %s143_s1 = inlined_call_operand.vmem [shape: bf16[32,16], index: 1, kind: input, shape index: {}]   ;;  %s144_s0 = inlined_call_operand.vmem [shape: bf16[2,32], index: 0, kind: input, shape index: {}]   ;;  %s145_s2 = inlined_call_operand.vmem [shape: bf16[2,16], index: 2, kind: output, shape index: {}]  }
   0x1   :  { %17 = vst.msk [vmem:[#allocation2] sm:$0x3] %vm16_vm0, %v112_v0  ;;  %100 = vmatprep.subr.bf16.mxu0 %v112_v0  ;;  %v110_v1 = vld [vmem:[%s143_s1] sm:$0xff]   ;;  %104 = vmatprep.mubr.msk.bf16.mxu0 %vm113_vm1, %v112_v0  ;;  %v111_v2 = vld [vmem:[%s143_s1 + $0x8] sm:$0xff]   ;;  %vm88_vm3 = vcmask 122880  }
   0x2   :  { %101 = vmatpush3.bf16.msra.mxu0 %v110_v1  ;;  %v19_v3 = vld [vmem:[%s144_s0] sm:$0x1] }
   0x3   :  { %102 = vmatprep.subr.bf16.mxu0 %v112_v0 }
   0x6   :  { %103 = vmatpush3.bf16.msra.mxu0 %v111_v2 }
   0x8   :  { %v18_v4 = vld [vmem:[#allocation2] sm:$0x3] }
   0x9   :  { %105 = vmatmul.mubr.msk.bf16.vlgmr.msra.gmra.mrb[0].mxu0 %vm36_vm2, %v19_v3 }
  0xdc   :  { %v74_v5 = vpop.f32.mrb[0].mxu0 }
  0xdd   :  { %v80_v6 = vadd.f32 %v74_v5, %v18_v4  ;;  %v106_v7 = vpop.f32.mrb[1].mxu0 }
  0xde   :  { %v77_v8 = vpop.f32.mrb[2].mxu0 }
  0xdf   :  { %82 = vst.msk [vmem:[#allocation2] sm:$0x3] %vm16_vm0, %v80_v6  ;;  %v107_v9 = vpop.f32.mrb[3].mxu0 }
  0xe6   :  { %v86_v10 = vld [vmem:[#allocation2] sm:$0x3] }
  0xe7   :  { %v87_v11 = vpack.c.bf16 %v86_v10, %v86_v10 }
  0xe9   :  { %89 = vst.msk [vmem:[%s145_s2] sm:$0x1] %vm88_vm3, %v87_v11 }

// kernel: vit_clip_forward.43
= control target key start
LH: loop header
LB: loop body
LE: loop exit
PB: predicated region body
PF: predicated region fallthrough
CT: control target
= control target key end

     0   :  { %vm15_vm0 = vcmask 254976   ;;  %vm47_vm1 = vcmask 253952   ;;  %s89_s0 = inlined_call_operand.vmem [shape: f32[2,32], index: 0, kind: input, shape index: {}]   ;;  %s90_s1 = inlined_call_operand.vmem [shape: f32[1,32], index: 1, kind: input, shape index: {}]   ;;  %s91_s2 = inlined_call_operand.vmem [shape: f32[1,32], index: 2, kind: input, shape index: {}]   ;;  %s92_s3 = inlined_call_operand.vmem [shape: bf16[2,32], index: 3, kind: output, shape index: {}]  }
   0x1   :  { %v14_v0 = vld [vmem:[%s89_s0] sm:$0x3] }
   0x2   :  { %v16_v1 = vsel %vm15_vm0, %v14_v0, 0.0  ;;  %v53_v11 = vld [vmem:[%s90_s1] ss:$0 sm:$0xff] }
   0x3   :  { %17 = vadd.xlane.f32.xlu0 %v16_v1  ;;  %v54_v13 = vld [vmem:[%s91_s2] ss:$0 sm:$0xff] }
  0x90   :  { %v18_v2 = vpop.xlane.xlu0 %17 }
  0x91   :  { %v20_v3 = vmul.f32 0.03125, %v18_v2 }
  0x93   :  { %v21_v4 = vsub.f32 %v14_v0, %v20_v3 }
  0x95   :  { %v22_v5 = vmul.f32 %v21_v4, %v21_v4 }
  0x97   :  { %v23_v6 = vsel %vm15_vm0, %v22_v5, 0.0 }
  0x98   :  { %24 = vadd.xlane.f32.xlu0 %v23_v6 }
 0x125   :  { %v25_v7 = vpop.xlane.xlu0 %24 }
 0x126   :  { %v26_v8 = vmul.f32 0.03125, %v25_v7 }
 0x128   :  { %v27_v9 = vadd.f32 1e-05, %v26_v8 }
 0x12a   :  { %55 = vrsqrt.f32 %v27_v9 }
 0x134   :  { %v56_v10 = vpop.eup %55 }
 0x135   :  { %v29_v12 = vmul.f32 %v56_v10, %v21_v4 }
 0x137   :  { %v37_v14 = vmul.f32 %v53_v11, %v29_v12 }
 0x139   :  { %v45_v15 = vadd.f32 %v54_v13, %v37_v14 }
 0x13b   :  { %v46_v16 = vpack.c.bf16 %v45_v15, %v45_v15 }
 0x13d   :  { %48 = vst.msk [vmem:[%s92_s3] sm:$0x1] %vm47_vm1, %v46_v16 }

// kernel: vit_clip_forward.45
= control target key start
LH: loop header
LB: loop body
LE: loop exit
PB: predicated region body
PF: predicated region fallthrough
CT: control target
= control target key end

     0   :  { %vm20_vm0 = vcmask 74752   ;;  %v145_v0 = vmov 0.0   ;;  %vm146_vm1 = vmmov 0   ;;  %s192_s0 = inlined_call_operand.vmem [shape: bf16[2,16], index: 0, kind: input, shape index: {}]   ;;  %s193_s1 = inlined_call_operand.vmem [shape: bf16[16,10], index: 1, kind: input, shape index: {}]   ;;  %s194_s2 = inlined_call_operand.vmem [shape: f32[1,10], index: 2, kind: input, shape index: {}]   ;;  %s195_s3 = inlined_call_operand.hbm [shape: f32[2,10], index: 3, kind: output, shape index: {}]  }
   0x1   :  { %21 = vst.msk [vmem:[#allocation2] sm:$0x3] %vm20_vm0, %v145_v0  ;;  %111 = vmatprep.subr.bf16.mxu0 %v145_v0  ;;  %v120_v1 = vld [vmem:[%s193_s1] sm:$0xff]   ;;  %113 = vmatprep.mubr.msk.bf16.mxu0 %vm146_vm1, %v145_v0 }
   0x2   :  { %8 = vsyncpa [#allocation4], 0  ;;  %112 = vmatpush3.bf16.msra.mxu0 %v120_v1  ;;  %v23_v2 = vld [vmem:[%s192_s0] sm:$0x1]  ;;  %vm32_vm2 = vcmask 130048   ;;  %s147_s17 = smov [#allocation3]  }
   0x3   :  { %v108_v9 = vld [vmem:[%s194_s2] ss:$0 sm:$0xff]  ;;  %s98_s18 = sshll.u32 %s147_s17, 4  ;;  %s99_s18 = int_to_ptr.vmem [resolvable:$true] %s98_s18 }
   0x4   :  { %s121_s0 = scalar_lea.vmem %s99_s18, 32  ;;  %p126_p1 = scmp.lt.s32.totalorder %s99_s18, %s99_s18 }
   0x5   :  { %114 = vmatmul.mubr.msk.bf16.vlgmr.msra.gmra.mrb[0].mxu0 %vm32_vm2, %v23_v2  ;;  %p122_p0 = scmp.ne.s32.totalorder %s99_s18, %s121_s0  ;;  %p127_p2 = scmp.lt.s32.totalorder %s121_s0, %s121_s0 }
   0x7   :  { %p128_p3 = por %p127_p2, %p126_p1 }
   0x8   :  { %v22_v3 = vld [vmem:[#allocation2] sm:$0x3] }
   0x9   :  { %p129_p4 = pnand %p128_p3, %p122_p0 }
  0xd8   :  { %v70_v4 = vpop.f32.mrb[0].mxu0 }
  0xd9   :  { %v76_v5 = vadd.f32 %v70_v4, %v22_v3  ;;  %v115_v6 = vpop.f32.mrb[1].mxu0 }
  0xda   :  { %v73_v7 = vpop.f32.mrb[2].mxu0 }
  0xdb   :  { %78 = vst.msk [vmem:[#allocation2] sm:$0x3] %vm20_vm0, %v76_v5  ;;  %v116_v8 = vpop.f32.mrb[3].mxu0 }
  0xe2   :  { %v82_v10 = vld [vmem:[#allocation2] sm:$0x3] }
  0xe3   :  { %v90_v11 = vadd.f32 %v108_v9, %v82_v10 }
  0xe5   :  { %91 = vst.msk [vmem:[#allocation3] sm:$0x3] %vm20_vm0, %v90_v11 }
  0xe6   :  { %132 = shalt.err (!%p129_p4)
}
  0xe7   :  { %s133_s21 = scalar_lea.hbm %s195_s3, 32 }
  0xe8   :  { %p134_p5 = scmp.ne.s32.totalorder %s195_s3, %s133_s21  ;;  %p137_p6 = scmp.lt.u32.totalorder %s133_s21, %s195_s3 }
  0xea   :  { %p139_p7 = pnand %p137_p6, %p134_p5 }
  0xec   :  { %142 = shalt.err (!%p139_p7)
}
  0xed   :  { %101 = dma.vmem_to_hbm [thread:$0]  %s99_s18, 32, %s195_s3, [#allocation4]  }
  0xee   :  { %143 = dma.done.wait [#allocation4], 32  }
  0xef   :  { %144 = vsyncadd [#allocation4], 4294967264 }
  0xf0   :  { %105 = vsyncpa [#allocation4], 1 }

</bundles_post_ra>
